<compile_context>
chip_gen: v5e
topology: v5e:2x2
jax: 0.10.0
libtpu: 0.0.40
codegen_flags: <defaults>
</compile_context>

<pallas_src>
import functools

import numpy as np

import jax
import jax.numpy as jnp
from jax.experimental import pallas as pl
from jax.experimental.pallas import tpu as pltpu


# ---------------------------------------------------------------------------
# VMEM budget: ~75% of physical VMEM (=> ~96 MiB on v5e/v6e's 128 MiB,
# ~48 MiB on v7x's 64 MiB), with a conservative fallback if the query fails.
# ---------------------------------------------------------------------------
@functools.lru_cache(maxsize=None)
def _vmem_limit_bytes():
    try:
        cap = int(pltpu.get_tpu_info().vmem_capacity_bytes)
        return max(32 * 1024 * 1024, min(cap * 3 // 4, 100 * 1024 * 1024))
    except Exception:
        return 48 * 1024 * 1024          # fits v7x's 64 MiB with headroom


def _round_up(x, m):
    return ((x + m - 1) // m) * m


def _pick_row_tile(m, cap=512):
    """MXU/sublane-aligned row tile: multiple of 128 once m is large enough
    (full systolic-array utilization, matters most on v5e), multiple of 8 for
    small m, capped so the working set stays inside the v7x VMEM budget."""
    if m >= 128:
        return min(_round_up(m, 128), cap)
    return _round_up(m, 8)


def _pick_col_tile(n, cap=512):
    """Lane-aligned column tile (multiple of 128): unmasked vector stores and
    the (K, N) weight streamed in column slabs instead of one VMEM window."""
    return min(_round_up(n, 128), cap)


# ---------------------------------------------------------------------------
# Generic row/column-tiled (M, K) @ (K, N) + (1, N) kernel.
# Grid = (N tiles, M tiles): M is the inner (fastest) axis and the weight block
# index depends only on the outer N axis, so each weight column slab is DMA'd
# once and reused across all row tiles.  Operands are cast to bf16 for MXU
# throughput / halved DMA bytes; accumulation and bias-add stay f32.
# ---------------------------------------------------------------------------
def _matmul_bias_kernel(x_ref, w_ref, b_ref, o_ref):
    o_ref[...] = (
        jnp.dot(x_ref[...], w_ref[...], preferred_element_type=jnp.float32)
        + b_ref[...]
    ).astype(o_ref.dtype)


def _matmul_bias(x, w, b, *, compute_dtype=jnp.bfloat16, out_dtype=jnp.float32,
                 tm_cap=512, tn_cap=512):
    m, k = x.shape
    n = w.shape[1]
    tm = _pick_row_tile(m, tm_cap)
    tn = _pick_col_tile(n, tn_cap)
    mp = _round_up(m, tm)
    np_pad = _round_up(n, tn)

    xc = x.astype(compute_dtype)
    wc = w.astype(compute_dtype)
    bc = b.astype(jnp.float32)
    if mp != m:
        xc = jnp.pad(xc, ((0, mp - m), (0, 0)))
    if np_pad != n:
        wc = jnp.pad(wc, ((0, 0), (0, np_pad - n)))
        bc = jnp.pad(bc, ((0, 0), (0, np_pad - n)))

    out = pl.pallas_call(
        _matmul_bias_kernel,
        out_shape=jax.ShapeDtypeStruct((mp, np_pad), out_dtype),
        grid_spec=pltpu.PrefetchScalarGridSpec(
            num_scalar_prefetch=0,
            grid=(np_pad // tn, mp // tm),                        # N outer, M inner
            in_specs=[
                pl.BlockSpec((tm, k), lambda nj, mi: (mi, 0)),    # activation rows
                pl.BlockSpec((k, tn), lambda nj, mi: (0, nj)),    # weight column slab
                pl.BlockSpec((1, tn), lambda nj, mi: (0, nj)),    # bias slab
            ],
            out_specs=pl.BlockSpec((tm, tn), lambda nj, mi: (mi, nj)),
        ),
        compiler_params=pltpu.CompilerParams(
            dimension_semantics=("parallel", "parallel"),         # megacore-shardable
            vmem_limit_bytes=_vmem_limit_bytes(),
        ),
    )(xc, wc, bc)

    if mp != m or np_pad != n:
        out = out[:m, :n]
    return out


# ---------------------------------------------------------------------------
# GRU recurrence kernel.  Grid = (batch tiles, time blocks); the time axis is
# sequential ("arbitrary") and the hidden state is carried in the VMEM-resident
# h_last output block.  All per-step operands are full lane-aligned (., H)
# blocks (gate-major layout); the hidden sequence is written batch-first.
# ---------------------------------------------------------------------------
def _gru_kernel(
    xr_ref,      # (T_blk, TB, H)  precomputed x@W_ir + b_ir for this time block
    xz_ref,      # (T_blk, TB, H)  precomputed x@W_iz + b_iz
    xn_ref,      # (T_blk, TB, H)  precomputed x@W_in + b_in
    h0_ref,      # (TB, H)         initial hidden state
    w_h_ref,     # (3, H, H)       gate-major hidden->gate weights (r|z|n)
    b_h_ref,     # (3, 1, H)       gate-major hidden biases (r|z|n)
    hs_ref,      # out: (TB, T_blk, H) batch-first hidden-state sequence
    h_last_ref,  # out: (TB, H)    resident across time blocks; final hidden state
):
    t_idx = pl.program_id(1)

    @pl.when(t_idx == 0)
    def _():
        h_last_ref[...] = h0_ref[...]

    t_blk = xr_ref.shape[0]

    # Loop-invariant weight/bias loads, hoisted out of the recurrence.
    w_hr, w_hz, w_hn = w_h_ref[0], w_h_ref[1], w_h_ref[2]
    b_hr, b_hz, b_hn = b_h_ref[0], b_h_ref[1], b_h_ref[2]
    # TODO(synk): for very large H, stage w_h once per block via
    # pltpu.matmul_push_rhs / matmul_acc_lhs to avoid re-staging the RHS each step.

    def step(t, h):
        # Three lane-aligned (TB,H)x(H,H) MXU dots -> no per-step XLU relayouts.
        hr = jnp.dot(h, w_hr, preferred_element_type=jnp.float32) + b_hr
        hz = jnp.dot(h, w_hz, preferred_element_type=jnp.float32) + b_hz
        hn = jnp.dot(h, w_hn, preferred_element_type=jnp.float32) + b_hn
        r = jax.nn.sigmoid(xr_ref[t] + hr)
        z = jax.nn.sigmoid(xz_ref[t] + hz)
        n = jnp.tanh(xn_ref[t] + r * hn)                 # b_hn inside r*(.) per PyTorch
        h_new = (1.0 - z) * n + z * h
        hs_ref[:, pl.ds(t, 1), :] = h_new[:, None, :]    # batch-first store
        return h_new

    # Partial unroll: LLO scheduling visibility without spilling the 64 vregs.
    h_last_ref[...] = jax.lax.fori_loop(
        0, t_blk, step, h_last_ref[...], unroll=min(8, t_blk))


def _pick_time_block(s, max_blk=64):
    """Divisor of s that is a multiple of 8 (sublane-aligned batch-first hs
    writes) and <= max_blk; falls back to the whole sequence as one block."""
    if s <= max_blk:
        return s
    for cand in range(max_blk - (max_blk % 8), 7, -8):
        if s % cand == 0:
            return cand
    return s


# ------------------------------ Forward wrapper -------------------------------
def rnnlm_forward(input_ids, params, hidden=None, *, batch_tiles=1):
    """input_ids: (B, S) int32.  Returns (logits (B,S,V), hidden (1,B,H)).

    batch_tiles > 1 adds a parallel batch-tile grid axis to the recurrence so
    v7x's two TensorCores each run an independent batch shard (leave at 1 on
    single-TensorCore v5e/v6e)."""
    emb_table = params["embedding"]
    B, S = input_ids.shape
    E = emb_table.shape[1]
    H = params["w_h"].shape[-1]
    V = params["w_out"].shape[1]

    # Glue: embedding gather directly in time-major order (only the tiny int32
    # id matrix is transposed, never the embedded activations).
    x_tm = jnp.take(emb_table, input_ids.T, axis=0)            # (S, B, E)
    x_flat = x_tm.reshape(S * B, E)

    # Hoisted input-gate pre-activations: one bf16 MXU matmul per gate so the
    # recurrence consumes full lane-aligned (B, H) slabs.
    xg = [
        _matmul_bias(x_flat, params["w_i"][g], params["b_i"][g]).reshape(S, B, H)
        for g in range(3)
    ]
    # TODO(synk): optionally fuse this matmul into the GRU kernel (stream the x
    # block per time step) if the recurrence turns out HBM-bound on xg.

    h0 = (jnp.zeros((B, H), jnp.float32) if hidden is None
          else hidden[0].astype(jnp.float32))

    # Batch tiling (v7x megacore); guard the sublane constraint on the tiles.
    bt = int(batch_tiles)
    if bt < 1 or B % bt != 0 or (bt > 1 and (B // bt) % 8 != 0):
        bt = 1
    TB = B // bt

    t_blk = _pick_time_block(S)

    hs, h_last = pl.pallas_call(
        _gru_kernel,
        out_shape=[
            jax.ShapeDtypeStruct((B, S, H), jnp.float32),      # batch-first hidden seq
            jax.ShapeDtypeStruct((B, H), jnp.float32),
        ],
        grid_spec=pltpu.PrefetchScalarGridSpec(
            num_scalar_prefetch=0,
            grid=(bt, S // t_blk),
            in_specs=[
                pl.BlockSpec((t_blk, TB, H), lambda b, t: (t, b, 0)),  # xg_r block
                pl.BlockSpec((t_blk, TB, H), lambda b, t: (t, b, 0)),  # xg_z block
                pl.BlockSpec((t_blk, TB, H), lambda b, t: (t, b, 0)),  # xg_n block
                pl.BlockSpec((TB, H), lambda b, t: (b, 0)),            # h0
                pl.BlockSpec((3, H, H), lambda b, t: (0, 0, 0)),       # w_h (invariant)
                pl.BlockSpec((3, 1, H), lambda b, t: (0, 0, 0)),       # b_h (invariant)
            ],
            out_specs=[
                pl.BlockSpec((TB, t_blk, H), lambda b, t: (b, t, 0)),  # hs (batch-first)
                pl.BlockSpec((TB, H), lambda b, t: (b, 0)),            # resident h carry
            ],
        ),
        compiler_params=pltpu.CompilerParams(
            dimension_semantics=("parallel", "arbitrary"),  # sequential over time
            vmem_limit_bytes=_vmem_limit_bytes(),
        ),
    )(xg[0], xg[1], xg[2], h0, params["w_h"], params["b_h"])

    # Hoisted, vocab-tiled output projection over the contiguous batch-first
    # hidden slab (no transpose of either hiddens or logits).
    logits = _matmul_bias(hs.reshape(B * S, H), params["w_out"], params["b_out"])
    logits = logits.reshape(B, S, V)

    return logits, h_last[None]                                 # hidden: (1, B, H)


# --------------------------- Pure-JAX reference (f32) -------------------------
def rnnlm_reference(input_ids, params, hidden=None):
    B, S = input_ids.shape
    H = params["w_h"].shape[-1]
    emb = jnp.take(params["embedding"], input_ids, axis=0)      # (B, S, E)
    h0 = jnp.zeros((B, H), jnp.float32) if hidden is None else hidden[0]

    w_ir, w_iz, w_in = params["w_i"]
    w_hr, w_hz, w_hn = params["w_h"]
    b_ir, b_iz, b_in = params["b_i"]
    b_hr, b_hz, b_hn = params["b_h"]

    def step(h, x_t):
        r = jax.nn.sigmoid(x_t @ w_ir + b_ir + h @ w_hr + b_hr)
        z = jax.nn.sigmoid(x_t @ w_iz + b_iz + h @ w_hz + b_hz)
        n = jnp.tanh(x_t @ w_in + b_in + r * (h @ w_hn + b_hn))
        h_new = (1.0 - z) * n + z * h
        return h_new, h_new

    h_last, hs = jax.lax.scan(step, h0, jnp.transpose(emb, (1, 0, 2)))
    logits = hs @ params["w_out"] + params["b_out"]              # (S, B, V)
    return jnp.transpose(logits, (1, 0, 2)), h_last[None]


# ------------------------------ Params init -----------------------------------
def init_params(key, vocab_size, embed_size, hidden_dim):
    ks = jax.random.split(key, 7)
    bound = 1.0 / np.sqrt(hidden_dim)

    def u(k, shape):
        return jax.random.uniform(k, shape, jnp.float32, -bound, bound)

    return {
        # nn.Embedding default: N(0, 1)
        "embedding": jax.random.normal(ks[0], (vocab_size, embed_size), jnp.float32),
        # Gate-major (r|z|n) GRU weights, stored transposed for x @ W.
        "w_i": u(ks[1], (3, embed_size, hidden_dim)),
        "w_h": u(ks[2], (3, hidden_dim, hidden_dim)),
        "b_i": u(ks[3], (3, 1, hidden_dim)),
        "b_h": u(ks[4], (3, 1, hidden_dim)),
        # nn.Linear(hidden_dim, vocab_size), stored transposed.
        "w_out": u(ks[5], (hidden_dim, vocab_size)),
        "b_out": u(ks[6], (1, vocab_size)),
    }


if __name__ == "__main__":
    vocab_size, embed_size, hidden_dim = 64, 32, 32
    batch, seq = 2, 8

    key = jax.random.PRNGKey(0)
    k_params, k_ids = jax.random.split(key)
    params = init_params(k_params, vocab_size, embed_size, hidden_dim)
    input_ids = jax.random.randint(k_ids, (batch, seq), 0, vocab_size, jnp.int32)

    fwd = jax.jit(rnnlm_forward)

    # Fresh hidden state (hidden=None path).
    logits, hidden = fwd(input_ids, params)
    jax.block_until_ready(logits)
    jax.block_until_ready(hidden)

    logits_ref, hidden_ref = rnnlm_reference(input_ids, params)
    np.testing.assert_allclose(np.asarray(logits), np.asarray(logits_ref),
                               rtol=2e-2, atol=2e-2)
    np.testing.assert_allclose(np.asarray(hidden), np.asarray(hidden_ref),
                               rtol=2e-2, atol=2e-2)

    # Provided hidden state path.
    logits2, hidden2 = fwd(input_ids, params, hidden)
    jax.block_until_ready(logits2)
    logits2_ref, hidden2_ref = rnnlm_reference(input_ids, params, hidden)
    np.testing.assert_allclose(np.asarray(logits2), np.asarray(logits2_ref),
                               rtol=2e-2, atol=2e-2)
    np.testing.assert_allclose(np.asarray(hidden2), np.asarray(hidden2_ref),
                               rtol=2e-2, atol=2e-2)

    assert logits.shape == (batch, seq, vocab_size)
    assert hidden.shape == (1, batch, hidden_dim)
    print("KERNEL_OK")
</pallas_src>

<mosaic_0001>
module attributes {stable_mosaic.version = 11 : i64} {
  func.func @_matmul_bias_kernel(%arg0: i32, %arg1: i32, %arg2: memref<16x32xbf16, #tpu.memory_space<vmem>>, %arg3: memref<32x128xbf16, #tpu.memory_space<vmem>>, %arg4: memref<1x128xf32, #tpu.memory_space<vmem>>, %arg5: memref<16x128xf32, #tpu.memory_space<vmem>>) attributes {dimension_semantics = [#tpu.dimension_semantics<parallel>, #tpu.dimension_semantics<parallel>], iteration_bounds = array<i64: 1, 1>, scalar_prefetch = 0 : i64, scratch_operands = 0 : i64, tpu.core_type = #tpu.core_type<tc>, window_params = [{transform_indices = @transform_0, window_bounds = array<i64: 16, 32>}, {transform_indices = @transform_1, window_bounds = array<i64: 32, 128>}, {transform_indices = @transform_2, window_bounds = array<i64: 1, 128>}, {transform_indices = @transform_3, window_bounds = array<i64: 16, 128>}]} {
    %c0 = arith.constant 0 : index
    %c0_0 = arith.constant 0 : index
    %0 = vector.load %arg2[%c0, %c0_0] : memref<16x32xbf16, #tpu.memory_space<vmem>>, vector<16x32xbf16>
    %c0_1 = arith.constant 0 : index
    %c0_2 = arith.constant 0 : index
    %1 = vector.load %arg3[%c0_1, %c0_2] : memref<32x128xbf16, #tpu.memory_space<vmem>>, vector<32x128xbf16>
    %cst = arith.constant dense<0.000000e+00> : vector<16x128xf32>
    %2 = tpu.matmul %0, %1, %cst {dimension_numbers = #tpu.dot_dimension_numbers<[1], [0], [0], [1], [0, 0, 1, 1], [], []>} : vector<16x32xbf16>, vector<32x128xbf16>, vector<16x128xf32> -> vector<16x128xf32>
    %c0_3 = arith.constant 0 : index
    %c0_4 = arith.constant 0 : index
    %3 = vector.load %arg4[%c0_3, %c0_4] : memref<1x128xf32, #tpu.memory_space<vmem>>, vector<1x128xf32>
    %4 = vector.broadcast %3 : vector<1x128xf32> to vector<16x128xf32>
    %5 = arith.addf %2, %4 : vector<16x128xf32>
    %c0_5 = arith.constant 0 : index
    %c0_6 = arith.constant 0 : index
    %6 = vector.load %arg5[%c0_5, %c0_6] : memref<16x128xf32, #tpu.memory_space<vmem>>, vector<16x128xf32>
    tpu.vector_store %arg5[%c0_5, %c0_6], %5 {strides = array<i32>} : memref<16x128xf32, #tpu.memory_space<vmem>>, vector<16x128xf32>,
    return
  }
  func.func @transform_0(%arg0: i32, %arg1: i32) -> (i32, i32) {
    %c0_i32 = arith.constant 0 : i32
    %c0_i32_0 = arith.constant 0 : i32
    return %arg1, %c0_i32 : i32, i32
  }
  func.func @transform_1(%arg0: i32, %arg1: i32) -> (i32, i32) {
    %c0_i32 = arith.constant 0 : i32
    %c0_i32_0 = arith.constant 0 : i32
    return %c0_i32, %arg0 : i32, i32
  }
  func.func @transform_2(%arg0: i32, %arg1: i32) -> (i32, i32) {
    %c0_i32 = arith.constant 0 : i32
    %c0_i32_0 = arith.constant 0 : i32
    return %c0_i32, %arg0 : i32, i32
  }
  func.func @transform_3(%arg0: i32, %arg1: i32) -> (i32, i32) {
    %c0_i32 = arith.constant 0 : i32
    return %arg1, %arg0 : i32, i32
  }
}

module attributes {stable_mosaic.version = 11 : i64} {
  func.func @_gru_kernel(%arg0: i32, %arg1: i32, %arg2: memref<8x2x32xf32, #tpu.memory_space<vmem>>, %arg3: memref<8x2x32xf32, #tpu.memory_space<vmem>>, %arg4: memref<8x2x32xf32, #tpu.memory_space<vmem>>, %arg5: memref<2x32xf32, #tpu.memory_space<vmem>>, %arg6: memref<3x32x32xf32, #tpu.memory_space<vmem>>, %arg7: memref<3x1x32xf32, #tpu.memory_space<vmem>>, %arg8: memref<2x8x32xf32, #tpu.memory_space<vmem>>, %arg9: memref<2x32xf32, #tpu.memory_space<vmem>>) attributes {dimension_semantics = [#tpu.dimension_semantics<parallel>, #tpu.dimension_semantics<arbitrary>], iteration_bounds = array<i64: 1, 1>, scalar_prefetch = 0 : i64, scratch_operands = 0 : i64, tpu.core_type = #tpu.core_type<tc>, window_params = [{transform_indices = @transform_0, window_bounds = array<i64: 8, 2, 32>}, {transform_indices = @transform_1, window_bounds = array<i64: 8, 2, 32>}, {transform_indices = @transform_2, window_bounds = array<i64: 8, 2, 32>}, {transform_indices = @transform_3, window_bounds = array<i64: 2, 32>}, {pipeline_mode = #tpu.pipeline_mode<synchronous>, transform_indices = @transform_4, window_bounds = array<i64: 3, 32, 32>}, {pipeline_mode = #tpu.pipeline_mode<synchronous>, transform_indices = @transform_5, window_bounds = array<i64: 3, 1, 32>}, {transform_indices = @transform_6, window_bounds = array<i64: 2, 8, 32>}, {transform_indices = @transform_7, window_bounds = array<i64: 2, 32>}]} {
    %c0_i32 = arith.constant 0 : i32
    %0 = arith.cmpi eq, %arg1, %c0_i32 : i32
    %1 = arith.extui %0 : i1 to i32
    %c0_i32_0 = arith.constant 0 : i32
    %2 = arith.cmpi ne, %1, %c0_i32_0 : i32
    scf.if %2 {
      %c0_132 = arith.constant 0 : index
      %c0_133 = arith.constant 0 : index
      %345 = vector.load %arg5[%c0_132, %c0_133] : memref<2x32xf32, #tpu.memory_space<vmem>>, vector<2x32xf32>
      %c0_134 = arith.constant 0 : index
      %c0_135 = arith.constant 0 : index
      %346 = vector.load %arg9[%c0_134, %c0_135] : memref<2x32xf32, #tpu.memory_space<vmem>>, vector<2x32xf32>
      tpu.vector_store %arg9[%c0_134, %c0_135], %345 {strides = array<i32>} : memref<2x32xf32, #tpu.memory_space<vmem>>, vector<2x32xf32>,
    } else {
    }
    %c0 = arith.constant 0 : index
    %c0_1 = arith.constant 0 : index
    %c0_2 = arith.constant 0 : index
    %3 = vector.load %arg6[%c0, %c0_1, %c0_2] : memref<3x32x32xf32, #tpu.memory_space<vmem>>, vector<1x32x32xf32>
    %4 = vector.shape_cast %3 : vector<1x32x32xf32> to vector<32x32xf32>
    %c1 = arith.constant 1 : index
    %c0_3 = arith.constant 0 : index
    %c0_4 = arith.constant 0 : index
    %5 = vector.load %arg6[%c1, %c0_3, %c0_4] : memref<3x32x32xf32, #tpu.memory_space<vmem>>, vector<1x32x32xf32>
    %6 = vector.shape_cast %5 : vector<1x32x32xf32> to vector<32x32xf32>
    %c2 = arith.constant 2 : index
    %c0_5 = arith.constant 0 : index
    %c0_6 = arith.constant 0 : index
    %7 = vector.load %arg6[%c2, %c0_5, %c0_6] : memref<3x32x32xf32, #tpu.memory_space<vmem>>, vector<1x32x32xf32>
    %8 = vector.shape_cast %7 : vector<1x32x32xf32> to vector<32x32xf32>
    %c0_7 = arith.constant 0 : index
    %c0_8 = arith.constant 0 : index
    %c0_9 = arith.constant 0 : index
    %9 = vector.load %arg7[%c0_7, %c0_8, %c0_9] : memref<3x1x32xf32, #tpu.memory_space<vmem>>, vector<1x1x32xf32>
    %10 = vector.shape_cast %9 : vector<1x1x32xf32> to vector<1x32xf32>
    %c1_10 = arith.constant 1 : index
    %c0_11 = arith.constant 0 : index
    %c0_12 = arith.constant 0 : index
    %11 = vector.load %arg7[%c1_10, %c0_11, %c0_12] : memref<3x1x32xf32, #tpu.memory_space<vmem>>, vector<1x1x32xf32>
    %12 = vector.shape_cast %11 : vector<1x1x32xf32> to vector<1x32xf32>
    %c2_13 = arith.constant 2 : index
    %c0_14 = arith.constant 0 : index
    %c0_15 = arith.constant 0 : index
    %13 = vector.load %arg7[%c2_13, %c0_14, %c0_15] : memref<3x1x32xf32, #tpu.memory_space<vmem>>, vector<1x1x32xf32>
    %14 = vector.shape_cast %13 : vector<1x1x32xf32> to vector<1x32xf32>
    %c0_16 = arith.constant 0 : index
    %c0_17 = arith.constant 0 : index
    %15 = vector.load %arg9[%c0_16, %c0_17] : memref<2x32xf32, #tpu.memory_space<vmem>>, vector<2x32xf32>
    %c0_i32_18 = arith.constant 0 : i32
    %cst = arith.constant dense<0.000000e+00> : vector<2x32xf32>
    %16 = tpu.matmul %15, %4, %cst {dimension_numbers = #tpu.dot_dimension_numbers<[1], [0], [0], [1], [0, 0, 1, 1], [], []>} : vector<2x32xf32>, vector<32x32xf32>, vector<2x32xf32> -> vector<2x32xf32>
    %17 = vector.broadcast %10 : vector<1x32xf32> to vector<2x32xf32>
    %18 = arith.addf %16, %17 : vector<2x32xf32>
    %cst_19 = arith.constant dense<0.000000e+00> : vector<2x32xf32>
    %19 = tpu.matmul %15, %6, %cst_19 {dimension_numbers = #tpu.dot_dimension_numbers<[1], [0], [0], [1], [0, 0, 1, 1], [], []>} : vector<2x32xf32>, vector<32x32xf32>, vector<2x32xf32> -> vector<2x32xf32>
    %20 = vector.broadcast %12 : vector<1x32xf32> to vector<2x32xf32>
    %21 = arith.addf %19, %20 : vector<2x32xf32>
    %cst_20 = arith.constant dense<0.000000e+00> : vector<2x32xf32>
    %22 = tpu.matmul %15, %8, %cst_20 {dimension_numbers = #tpu.dot_dimension_numbers<[1], [0], [0], [1], [0, 0, 1, 1], [], []>} : vector<2x32xf32>, vector<32x32xf32>, vector<2x32xf32> -> vector<2x32xf32>
    %23 = vector.broadcast %14 : vector<1x32xf32> to vector<2x32xf32>
    %24 = arith.addf %22, %23 : vector<2x32xf32>
    %25 = arith.index_cast %c0_i32_18 : i32 to index
    %c0_21 = arith.constant 0 : index
    %c0_22 = arith.constant 0 : index
    %26 = vector.load %arg2[%25, %c0_21, %c0_22] : memref<8x2x32xf32, #tpu.memory_space<vmem>>, vector<1x2x32xf32>
    %27 = vector.shape_cast %26 : vector<1x2x32xf32> to vector<2x32xf32>
    %28 = arith.addf %27, %18 : vector<2x32xf32>
    %29 = arith.negf %28 : vector<2x32xf32>
    %30 = math.exp %29 : vector<2x32xf32>
    %cst_23 = arith.constant 1.000000e+00 : f32
    %31 = vector.broadcast %cst_23 : f32 to vector<2x32xf32>
    %32 = arith.addf %31, %30 : vector<2x32xf32>
    %33 = arith.divf %31, %32 : vector<2x32xf32>
    %34 = arith.index_cast %c0_i32_18 : i32 to index
    %c0_24 = arith.constant 0 : index
    %c0_25 = arith.constant 0 : index
    %35 = vector.load %arg3[%34, %c0_24, %c0_25] : memref<8x2x32xf32, #tpu.memory_space<vmem>>, vector<1x2x32xf32>
    %36 = vector.shape_cast %35 : vector<1x2x32xf32> to vector<2x32xf32>
    %37 = arith.addf %36, %21 : vector<2x32xf32>
    %38 = arith.negf %37 : vector<2x32xf32>
    %39 = math.exp %38 : vector<2x32xf32>
    %cst_26 = arith.constant 1.000000e+00 : f32
    %40 = vector.broadcast %cst_26 : f32 to vector<2x32xf32>
    %41 = arith.addf %40, %39 : vector<2x32xf32>
    %42 = arith.divf %40, %41 : vector<2x32xf32>
    %43 = arith.index_cast %c0_i32_18 : i32 to index
    %c0_27 = arith.constant 0 : index
    %c0_28 = arith.constant 0 : index
    %44 = vector.load %arg4[%43, %c0_27, %c0_28] : memref<8x2x32xf32, #tpu.memory_space<vmem>>, vector<1x2x32xf32>
    %45 = vector.shape_cast %44 : vector<1x2x32xf32> to vector<2x32xf32>
    %46 = arith.mulf %33, %24 : vector<2x32xf32>
    %47 = arith.addf %45, %46 : vector<2x32xf32>
    %48 = math.tanh %47 : vector<2x32xf32>
    %cst_29 = arith.constant 1.000000e+00 : f32
    %49 = vector.broadcast %cst_29 : f32 to vector<2x32xf32>
    %50 = arith.subf %49, %42 : vector<2x32xf32>
    %51 = arith.mulf %50, %48 : vector<2x32xf32>
    %52 = arith.mulf %42, %15 : vector<2x32xf32>
    %53 = arith.addf %51, %52 : vector<2x32xf32>
    %54 = vector.shape_cast %53 : vector<2x32xf32> to vector<2x1x32xf32>
    %c0_30 = arith.constant 0 : index
    %55 = arith.index_cast %c0_i32_18 : i32 to index
    %c0_31 = arith.constant 0 : index
    %56 = vector.load %arg8[%c0_30, %55, %c0_31] : memref<2x8x32xf32, #tpu.memory_space<vmem>>, vector<2x1x32xf32>
    tpu.vector_store %arg8[%c0_30, %55, %c0_31], %54 {strides = array<i32>} : memref<2x8x32xf32, #tpu.memory_space<vmem>>, vector<2x1x32xf32>,
    %c1_i32 = arith.constant 1 : i32
    %cst_32 = arith.constant dense<0.000000e+00> : vector<2x32xf32>
    %57 = tpu.matmul %53, %4, %cst_32 {dimension_numbers = #tpu.dot_dimension_numbers<[1], [0], [0], [1], [0, 0, 1, 1], [], []>} : vector<2x32xf32>, vector<32x32xf32>, vector<2x32xf32> -> vector<2x32xf32>
    %58 = vector.broadcast %10 : vector<1x32xf32> to vector<2x32xf32>
    %59 = arith.addf %57, %58 : vector<2x32xf32>
    %cst_33 = arith.constant dense<0.000000e+00> : vector<2x32xf32>
    %60 = tpu.matmul %53, %6, %cst_33 {dimension_numbers = #tpu.dot_dimension_numbers<[1], [0], [0], [1], [0, 0, 1, 1], [], []>} : vector<2x32xf32>, vector<32x32xf32>, vector<2x32xf32> -> vector<2x32xf32>
    %61 = vector.broadcast %12 : vector<1x32xf32> to vector<2x32xf32>
    %62 = arith.addf %60, %61 : vector<2x32xf32>
    %cst_34 = arith.constant dense<0.000000e+00> : vector<2x32xf32>
    %63 = tpu.matmul %53, %8, %cst_34 {dimension_numbers = #tpu.dot_dimension_numbers<[1], [0], [0], [1], [0, 0, 1, 1], [], []>} : vector<2x32xf32>, vector<32x32xf32>, vector<2x32xf32> -> vector<2x32xf32>
    %64 = vector.broadcast %14 : vector<1x32xf32> to vector<2x32xf32>
    %65 = arith.addf %63, %64 : vector<2x32xf32>
    %66 = arith.index_cast %c1_i32 : i32 to index
    %c0_35 = arith.constant 0 : index
    %c0_36 = arith.constant 0 : index
    %67 = vector.load %arg2[%66, %c0_35, %c0_36] : memref<8x2x32xf32, #tpu.memory_space<vmem>>, vector<1x2x32xf32>
    %68 = vector.shape_cast %67 : vector<1x2x32xf32> to vector<2x32xf32>
    %69 = arith.addf %68, %59 : vector<2x32xf32>
    %70 = arith.negf %69 : vector<2x32xf32>
    %71 = math.exp %70 : vector<2x32xf32>
    %cst_37 = arith.constant 1.000000e+00 : f32
    %72 = vector.broadcast %cst_37 : f32 to vector<2x32xf32>
    %73 = arith.addf %72, %71 : vector<2x32xf32>
    %74 = arith.divf %72, %73 : vector<2x32xf32>
    %75 = arith.index_cast %c1_i32 : i32 to index
    %c0_38 = arith.constant 0 : index
    %c0_39 = arith.constant 0 : index
    %76 = vector.load %arg3[%75, %c0_38, %c0_39] : memref<8x2x32xf32, #tpu.memory_space<vmem>>, vector<1x2x32xf32>
    %77 = vector.shape_cast %76 : vector<1x2x32xf32> to vector<2x32xf32>
    %78 = arith.addf %77, %62 : vector<2x32xf32>
    %79 = arith.negf %78 : vector<2x32xf32>
    %80 = math.exp %79 : vector<2x32xf32>
    %cst_40 = arith.constant 1.000000e+00 : f32
    %81 = vector.broadcast %cst_40 : f32 to vector<2x32xf32>
    %82 = arith.addf %81, %80 : vector<2x32xf32>
    %83 = arith.divf %81, %82 : vector<2x32xf32>
    %84 = arith.index_cast %c1_i32 : i32 to index
    %c0_41 = arith.constant 0 : index
    %c0_42 = arith.constant 0 : index
    %85 = vector.load %arg4[%84, %c0_41, %c0_42] : memref<8x2x32xf32, #tpu.memory_space<vmem>>, vector<1x2x32xf32>
    %86 = vector.shape_cast %85 : vector<1x2x32xf32> to vector<2x32xf32>
    %87 = arith.mulf %74, %65 : vector<2x32xf32>
    %88 = arith.addf %86, %87 : vector<2x32xf32>
    %89 = math.tanh %88 : vector<2x32xf32>
    %cst_43 = arith.constant 1.000000e+00 : f32
    %90 = vector.broadcast %cst_43 : f32 to vector<2x32xf32>
    %91 = arith.subf %90, %83 : vector<2x32xf32>
    %92 = arith.mulf %91, %89 : vector<2x32xf32>
    %93 = arith.mulf %83, %53 : vector<2x32xf32>
    %94 = arith.addf %92, %93 : vector<2x32xf32>
    %95 = vector.shape_cast %94 : vector<2x32xf32> to vector<2x1x32xf32>
    %c0_44 = arith.constant 0 : index
    %96 = arith.index_cast %c1_i32 : i32 to index
    %c0_45 = arith.constant 0 : index
    %97 = vector.load %arg8[%c0_44, %96, %c0_45] : memref<2x8x32xf32, #tpu.memory_space<vmem>>, vector<2x1x32xf32>
    tpu.vector_store %arg8[%c0_44, %96, %c0_45], %95 {strides = array<i32>} : memref<2x8x32xf32, #tpu.memory_space<vmem>>, vector<2x1x32xf32>,
    %c2_i32 = arith.constant 2 : i32
    %cst_46 = arith.constant dense<0.000000e+00> : vector<2x32xf32>
    %98 = tpu.matmul %94, %4, %cst_46 {dimension_numbers = #tpu.dot_dimension_numbers<[1], [0], [0], [1], [0, 0, 1, 1], [], []>} : vector<2x32xf32>, vector<32x32xf32>, vector<2x32xf32> -> vector<2x32xf32>
    %99 = vector.broadcast %10 : vector<1x32xf32> to vector<2x32xf32>
    %100 = arith.addf %98, %99 : vector<2x32xf32>
    %cst_47 = arith.constant dense<0.000000e+00> : vector<2x32xf32>
    %101 = tpu.matmul %94, %6, %cst_47 {dimension_numbers = #tpu.dot_dimension_numbers<[1], [0], [0], [1], [0, 0, 1, 1], [], []>} : vector<2x32xf32>, vector<32x32xf32>, vector<2x32xf32> -> vector<2x32xf32>
    %102 = vector.broadcast %12 : vector<1x32xf32> to vector<2x32xf32>
    %103 = arith.addf %101, %102 : vector<2x32xf32>
    %cst_48 = arith.constant dense<0.000000e+00> : vector<2x32xf32>
    %104 = tpu.matmul %94, %8, %cst_48 {dimension_numbers = #tpu.dot_dimension_numbers<[1], [0], [0], [1], [0, 0, 1, 1], [], []>} : vector<2x32xf32>, vector<32x32xf32>, vector<2x32xf32> -> vector<2x32xf32>
    %105 = vector.broadcast %14 : vector<1x32xf32> to vector<2x32xf32>
    %106 = arith.addf %104, %105 : vector<2x32xf32>
    %107 = arith.index_cast %c2_i32 : i32 to index
    %c0_49 = arith.constant 0 : index
    %c0_50 = arith.constant 0 : index
    %108 = vector.load %arg2[%107, %c0_49, %c0_50] : memref<8x2x32xf32, #tpu.memory_space<vmem>>, vector<1x2x32xf32>
    %109 = vector.shape_cast %108 : vector<1x2x32xf32> to vector<2x32xf32>
    %110 = arith.addf %109, %100 : vector<2x32xf32>
    %111 = arith.negf %110 : vector<2x32xf32>
    %112 = math.exp %111 : vector<2x32xf32>
    %cst_51 = arith.constant 1.000000e+00 : f32
    %113 = vector.broadcast %cst_51 : f32 to vector<2x32xf32>
    %114 = arith.addf %113, %112 : vector<2x32xf32>
    %115 = arith.divf %113, %114 : vector<2x32xf32>
    %116 = arith.index_cast %c2_i32 : i32 to index
    %c0_52 = arith.constant 0 : index
    %c0_53 = arith.constant 0 : index
    %117 = vector.load %arg3[%116, %c0_52, %c0_53] : memref<8x2x32xf32, #tpu.memory_space<vmem>>, vector<1x2x32xf32>
    %118 = vector.shape_cast %117 : vector<1x2x32xf32> to vector<2x32xf32>
    %119 = arith.addf %118, %103 : vector<2x32xf32>
    %120 = arith.negf %119 : vector<2x32xf32>
    %121 = math.exp %120 : vector<2x32xf32>
    %cst_54 = arith.constant 1.000000e+00 : f32
    %122 = vector.broadcast %cst_54 : f32 to vector<2x32xf32>
    %123 = arith.addf %122, %121 : vector<2x32xf32>
    %124 = arith.divf %122, %123 : vector<2x32xf32>
    %125 = arith.index_cast %c2_i32 : i32 to index
    %c0_55 = arith.constant 0 : index
    %c0_56 = arith.constant 0 : index
    %126 = vector.load %arg4[%125, %c0_55, %c0_56] : memref<8x2x32xf32, #tpu.memory_space<vmem>>, vector<1x2x32xf32>
    %127 = vector.shape_cast %126 : vector<1x2x32xf32> to vector<2x32xf32>
    %128 = arith.mulf %115, %106 : vector<2x32xf32>
    %129 = arith.addf %127, %128 : vector<2x32xf32>
    %130 = math.tanh %129 : vector<2x32xf32>
    %cst_57 = arith.constant 1.000000e+00 : f32
    %131 = vector.broadcast %cst_57 : f32 to vector<2x32xf32>
    %132 = arith.subf %131, %124 : vector<2x32xf32>
    %133 = arith.mulf %132, %130 : vector<2x32xf32>
    %134 = arith.mulf %124, %94 : vector<2x32xf32>
    %135 = arith.addf %133, %134 : vector<2x32xf32>
    %136 = vector.shape_cast %135 : vector<2x32xf32> to vector<2x1x32xf32>
    %c0_58 = arith.constant 0 : index
    %137 = arith.index_cast %c2_i32 : i32 to index
    %c0_59 = arith.constant 0 : index
    %138 = vector.load %arg8[%c0_58, %137, %c0_59] : memref<2x8x32xf32, #tpu.memory_space<vmem>>, vector<2x1x32xf32>
    tpu.vector_store %arg8[%c0_58, %137, %c0_59], %136 {strides = array<i32>} : memref<2x8x32xf32, #tpu.memory_space<vmem>>, vector<2x1x32xf32>,
    %c3_i32 = arith.constant 3 : i32
    %cst_60 = arith.constant dense<0.000000e+00> : vector<2x32xf32>
    %139 = tpu.matmul %135, %4, %cst_60 {dimension_numbers = #tpu.dot_dimension_numbers<[1], [0], [0], [1], [0, 0, 1, 1], [], []>} : vector<2x32xf32>, vector<32x32xf32>, vector<2x32xf32> -> vector<2x32xf32>
    %140 = vector.broadcast %10 : vector<1x32xf32> to vector<2x32xf32>
    %141 = arith.addf %139, %140 : vector<2x32xf32>
    %cst_61 = arith.constant dense<0.000000e+00> : vector<2x32xf32>
    %142 = tpu.matmul %135, %6, %cst_61 {dimension_numbers = #tpu.dot_dimension_numbers<[1], [0], [0], [1], [0, 0, 1, 1], [], []>} : vector<2x32xf32>, vector<32x32xf32>, vector<2x32xf32> -> vector<2x32xf32>
    %143 = vector.broadcast %12 : vector<1x32xf32> to vector<2x32xf32>
    %144 = arith.addf %142, %143 : vector<2x32xf32>
    %cst_62 = arith.constant dense<0.000000e+00> : vector<2x32xf32>
    %145 = tpu.matmul %135, %8, %cst_62 {dimension_numbers = #tpu.dot_dimension_numbers<[1], [0], [0], [1], [0, 0, 1, 1], [], []>} : vector<2x32xf32>, vector<32x32xf32>, vector<2x32xf32> -> vector<2x32xf32>
    %146 = vector.broadcast %14 : vector<1x32xf32> to vector<2x32xf32>
    %147 = arith.addf %145, %146 : vector<2x32xf32>
    %148 = arith.index_cast %c3_i32 : i32 to index
    %c0_63 = arith.constant 0 : index
    %c0_64 = arith.constant 0 : index
    %149 = vector.load %arg2[%148, %c0_63, %c0_64] : memref<8x2x32xf32, #tpu.memory_space<vmem>>, vector<1x2x32xf32>
    %150 = vector.shape_cast %149 : vector<1x2x32xf32> to vector<2x32xf32>
    %151 = arith.addf %150, %141 : vector<2x32xf32>
    %152 = arith.negf %151 : vector<2x32xf32>
    %153 = math.exp %152 : vector<2x32xf32>
    %cst_65 = arith.constant 1.000000e+00 : f32
    %154 = vector.broadcast %cst_65 : f32 to vector<2x32xf32>
    %155 = arith.addf %154, %153 : vector<2x32xf32>
    %156 = arith.divf %154, %155 : vector<2x32xf32>
    %157 = arith.index_cast %c3_i32 : i32 to index
    %c0_66 = arith.constant 0 : index
    %c0_67 = arith.constant 0 : index
    %158 = vector.load %arg3[%157, %c0_66, %c0_67] : memref<8x2x32xf32, #tpu.memory_space<vmem>>, vector<1x2x32xf32>
    %159 = vector.shape_cast %158 : vector<1x2x32xf32> to vector<2x32xf32>
    %160 = arith.addf %159, %144 : vector<2x32xf32>
    %161 = arith.negf %160 : vector<2x32xf32>
    %162 = math.exp %161 : vector<2x32xf32>
    %cst_68 = arith.constant 1.000000e+00 : f32
    %163 = vector.broadcast %cst_68 : f32 to vector<2x32xf32>
    %164 = arith.addf %163, %162 : vector<2x32xf32>
    %165 = arith.divf %163, %164 : vector<2x32xf32>
    %166 = arith.index_cast %c3_i32 : i32 to index
    %c0_69 = arith.constant 0 : index
    %c0_70 = arith.constant 0 : index
    %167 = vector.load %arg4[%166, %c0_69, %c0_70] : memref<8x2x32xf32, #tpu.memory_space<vmem>>, vector<1x2x32xf32>
    %168 = vector.shape_cast %167 : vector<1x2x32xf32> to vector<2x32xf32>
    %169 = arith.mulf %156, %147 : vector<2x32xf32>
    %170 = arith.addf %168, %169 : vector<2x32xf32>
    %171 = math.tanh %170 : vector<2x32xf32>
    %cst_71 = arith.constant 1.000000e+00 : f32
    %172 = vector.broadcast %cst_71 : f32 to vector<2x32xf32>
    %173 = arith.subf %172, %165 : vector<2x32xf32>
    %174 = arith.mulf %173, %171 : vector<2x32xf32>
    %175 = arith.mulf %165, %135 : vector<2x32xf32>
    %176 = arith.addf %174, %175 : vector<2x32xf32>
    %177 = vector.shape_cast %176 : vector<2x32xf32> to vector<2x1x32xf32>
    %c0_72 = arith.constant 0 : index
    %178 = arith.index_cast %c3_i32 : i32 to index
    %c0_73 = arith.constant 0 : index
    %179 = vector.load %arg8[%c0_72, %178, %c0_73] : memref<2x8x32xf32, #tpu.memory_space<vmem>>, vector<2x1x32xf32>
    tpu.vector_store %arg8[%c0_72, %178, %c0_73], %177 {strides = array<i32>} : memref<2x8x32xf32, #tpu.memory_space<vmem>>, vector<2x1x32xf32>,
    %c4_i32 = arith.constant 4 : i32
    %cst_74 = arith.constant dense<0.000000e+00> : vector<2x32xf32>
    %180 = tpu.matmul %176, %4, %cst_74 {dimension_numbers = #tpu.dot_dimension_numbers<[1], [0], [0], [1], [0, 0, 1, 1], [], []>} : vector<2x32xf32>, vector<32x32xf32>, vector<2x32xf32> -> vector<2x32xf32>
    %181 = vector.broadcast %10 : vector<1x32xf32> to vector<2x32xf32>
    %182 = arith.addf %180, %181 : vector<2x32xf32>
    %cst_75 = arith.constant dense<0.000000e+00> : vector<2x32xf32>
    %183 = tpu.matmul %176, %6, %cst_75 {dimension_numbers = #tpu.dot_dimension_numbers<[1], [0], [0], [1], [0, 0, 1, 1], [], []>} : vector<2x32xf32>, vector<32x32xf32>, vector<2x32xf32> -> vector<2x32xf32>
    %184 = vector.broadcast %12 : vector<1x32xf32> to vector<2x32xf32>
    %185 = arith.addf %183, %184 : vector<2x32xf32>
    %cst_76 = arith.constant dense<0.000000e+00> : vector<2x32xf32>
    %186 = tpu.matmul %176, %8, %cst_76 {dimension_numbers = #tpu.dot_dimension_numbers<[1], [0], [0], [1], [0, 0, 1, 1], [], []>} : vector<2x32xf32>, vector<32x32xf32>, vector<2x32xf32> -> vector<2x32xf32>
    %187 = vector.broadcast %14 : vector<1x32xf32> to vector<2x32xf32>
    %188 = arith.addf %186, %187 : vector<2x32xf32>
    %189 = arith.index_cast %c4_i32 : i32 to index
    %c0_77 = arith.constant 0 : index
    %c0_78 = arith.constant 0 : index
    %190 = vector.load %arg2[%189, %c0_77, %c0_78] : memref<8x2x32xf32, #tpu.memory_space<vmem>>, vector<1x2x32xf32>
    %191 = vector.shape_cast %190 : vector<1x2x32xf32> to vector<2x32xf32>
    %192 = arith.addf %191, %182 : vector<2x32xf32>
    %193 = arith.negf %192 : vector<2x32xf32>
    %194 = math.exp %193 : vector<2x32xf32>
    %cst_79 = arith.constant 1.000000e+00 : f32
    %195 = vector.broadcast %cst_79 : f32 to vector<2x32xf32>
    %196 = arith.addf %195, %194 : vector<2x32xf32>
    %197 = arith.divf %195, %196 : vector<2x32xf32>
    %198 = arith.index_cast %c4_i32 : i32 to index
    %c0_80 = arith.constant 0 : index
    %c0_81 = arith.constant 0 : index
    %199 = vector.load %arg3[%198, %c0_80, %c0_81] : memref<8x2x32xf32, #tpu.memory_space<vmem>>, vector<1x2x32xf32>
    %200 = vector.shape_cast %199 : vector<1x2x32xf32> to vector<2x32xf32>
    %201 = arith.addf %200, %185 : vector<2x32xf32>
    %202 = arith.negf %201 : vector<2x32xf32>
    %203 = math.exp %202 : vector<2x32xf32>
    %cst_82 = arith.constant 1.000000e+00 : f32
    %204 = vector.broadcast %cst_82 : f32 to vector<2x32xf32>
    %205 = arith.addf %204, %203 : vector<2x32xf32>
    %206 = arith.divf %204, %205 : vector<2x32xf32>
    %207 = arith.index_cast %c4_i32 : i32 to index
    %c0_83 = arith.constant 0 : index
    %c0_84 = arith.constant 0 : index
    %208 = vector.load %arg4[%207, %c0_83, %c0_84] : memref<8x2x32xf32, #tpu.memory_space<vmem>>, vector<1x2x32xf32>
    %209 = vector.shape_cast %208 : vector<1x2x32xf32> to vector<2x32xf32>
    %210 = arith.mulf %197, %188 : vector<2x32xf32>
    %211 = arith.addf %209, %210 : vector<2x32xf32>
    %212 = math.tanh %211 : vector<2x32xf32>
    %cst_85 = arith.constant 1.000000e+00 : f32
    %213 = vector.broadcast %cst_85 : f32 to vector<2x32xf32>
    %214 = arith.subf %213, %206 : vector<2x32xf32>
    %215 = arith.mulf %214, %212 : vector<2x32xf32>
    %216 = arith.mulf %206, %176 : vector<2x32xf32>
    %217 = arith.addf %215, %216 : vector<2x32xf32>
    %218 = vector.shape_cast %217 : vector<2x32xf32> to vector<2x1x32xf32>
    %c0_86 = arith.constant 0 : index
    %219 = arith.index_cast %c4_i32 : i32 to index
    %c0_87 = arith.constant 0 : index
    %220 = vector.load %arg8[%c0_86, %219, %c0_87] : memref<2x8x32xf32, #tpu.memory_space<vmem>>, vector<2x1x32xf32>
    tpu.vector_store %arg8[%c0_86, %219, %c0_87], %218 {strides = array<i32>} : memref<2x8x32xf32, #tpu.memory_space<vmem>>, vector<2x1x32xf32>,
    %c5_i32 = arith.constant 5 : i32
    %cst_88 = arith.constant dense<0.000000e+00> : vector<2x32xf32>
    %221 = tpu.matmul %217, %4, %cst_88 {dimension_numbers = #tpu.dot_dimension_numbers<[1], [0], [0], [1], [0, 0, 1, 1], [], []>} : vector<2x32xf32>, vector<32x32xf32>, vector<2x32xf32> -> vector<2x32xf32>
    %222 = vector.broadcast %10 : vector<1x32xf32> to vector<2x32xf32>
    %223 = arith.addf %221, %222 : vector<2x32xf32>
    %cst_89 = arith.constant dense<0.000000e+00> : vector<2x32xf32>
    %224 = tpu.matmul %217, %6, %cst_89 {dimension_numbers = #tpu.dot_dimension_numbers<[1], [0], [0], [1], [0, 0, 1, 1], [], []>} : vector<2x32xf32>, vector<32x32xf32>, vector<2x32xf32> -> vector<2x32xf32>
    %225 = vector.broadcast %12 : vector<1x32xf32> to vector<2x32xf32>
    %226 = arith.addf %224, %225 : vector<2x32xf32>
    %cst_90 = arith.constant dense<0.000000e+00> : vector<2x32xf32>
    %227 = tpu.matmul %217, %8, %cst_90 {dimension_numbers = #tpu.dot_dimension_numbers<[1], [0], [0], [1], [0, 0, 1, 1], [], []>} : vector<2x32xf32>, vector<32x32xf32>, vector<2x32xf32> -> vector<2x32xf32>
    %228 = vector.broadcast %14 : vector<1x32xf32> to vector<2x32xf32>
    %229 = arith.addf %227, %228 : vector<2x32xf32>
    %230 = arith.index_cast %c5_i32 : i32 to index
    %c0_91 = arith.constant 0 : index
    %c0_92 = arith.constant 0 : index
    %231 = vector.load %arg2[%230, %c0_91, %c0_92] : memref<8x2x32xf32, #tpu.memory_space<vmem>>, vector<1x2x32xf32>
    %232 = vector.shape_cast %231 : vector<1x2x32xf32> to vector<2x32xf32>
    %233 = arith.addf %232, %223 : vector<2x32xf32>
    %234 = arith.negf %233 : vector<2x32xf32>
    %235 = math.exp %234 : vector<2x32xf32>
    %cst_93 = arith.constant 1.000000e+00 : f32
    %236 = vector.broadcast %cst_93 : f32 to vector<2x32xf32>
    %237 = arith.addf %236, %235 : vector<2x32xf32>
    %238 = arith.divf %236, %237 : vector<2x32xf32>
    %239 = arith.index_cast %c5_i32 : i32 to index
    %c0_94 = arith.constant 0 : index
    %c0_95 = arith.constant 0 : index
    %240 = vector.load %arg3[%239, %c0_94, %c0_95] : memref<8x2x32xf32, #tpu.memory_space<vmem>>, vector<1x2x32xf32>
    %241 = vector.shape_cast %240 : vector<1x2x32xf32> to vector<2x32xf32>
    %242 = arith.addf %241, %226 : vector<2x32xf32>
    %243 = arith.negf %242 : vector<2x32xf32>
    %244 = math.exp %243 : vector<2x32xf32>
    %cst_96 = arith.constant 1.000000e+00 : f32
    %245 = vector.broadcast %cst_96 : f32 to vector<2x32xf32>
    %246 = arith.addf %245, %244 : vector<2x32xf32>
    %247 = arith.divf %245, %246 : vector<2x32xf32>
    %248 = arith.index_cast %c5_i32 : i32 to index
    %c0_97 = arith.constant 0 : index
    %c0_98 = arith.constant 0 : index
    %249 = vector.load %arg4[%248, %c0_97, %c0_98] : memref<8x2x32xf32, #tpu.memory_space<vmem>>, vector<1x2x32xf32>
    %250 = vector.shape_cast %249 : vector<1x2x32xf32> to vector<2x32xf32>
    %251 = arith.mulf %238, %229 : vector<2x32xf32>
    %252 = arith.addf %250, %251 : vector<2x32xf32>
    %253 = math.tanh %252 : vector<2x32xf32>
    %cst_99 = arith.constant 1.000000e+00 : f32
    %254 = vector.broadcast %cst_99 : f32 to vector<2x32xf32>
    %255 = arith.subf %254, %247 : vector<2x32xf32>
    %256 = arith.mulf %255, %253 : vector<2x32xf32>
    %257 = arith.mulf %247, %217 : vector<2x32xf32>
    %258 = arith.addf %256, %257 : vector<2x32xf32>
    %259 = vector.shape_cast %258 : vector<2x32xf32> to vector<2x1x32xf32>
    %c0_100 = arith.constant 0 : index
    %260 = arith.index_cast %c5_i32 : i32 to index
    %c0_101 = arith.constant 0 : index
    %261 = vector.load %arg8[%c0_100, %260, %c0_101] : memref<2x8x32xf32, #tpu.memory_space<vmem>>, vector<2x1x32xf32>
    tpu.vector_store %arg8[%c0_100, %260, %c0_101], %259 {strides = array<i32>} : memref<2x8x32xf32, #tpu.memory_space<vmem>>, vector<2x1x32xf32>,
    %c6_i32 = arith.constant 6 : i32
    %cst_102 = arith.constant dense<0.000000e+00> : vector<2x32xf32>
    %262 = tpu.matmul %258, %4, %cst_102 {dimension_numbers = #tpu.dot_dimension_numbers<[1], [0], [0], [1], [0, 0, 1, 1], [], []>} : vector<2x32xf32>, vector<32x32xf32>, vector<2x32xf32> -> vector<2x32xf32>
    %263 = vector.broadcast %10 : vector<1x32xf32> to vector<2x32xf32>
    %264 = arith.addf %262, %263 : vector<2x32xf32>
    %cst_103 = arith.constant dense<0.000000e+00> : vector<2x32xf32>
    %265 = tpu.matmul %258, %6, %cst_103 {dimension_numbers = #tpu.dot_dimension_numbers<[1], [0], [0], [1], [0, 0, 1, 1], [], []>} : vector<2x32xf32>, vector<32x32xf32>, vector<2x32xf32> -> vector<2x32xf32>
    %266 = vector.broadcast %12 : vector<1x32xf32> to vector<2x32xf32>
    %267 = arith.addf %265, %266 : vector<2x32xf32>
    %cst_104 = arith.constant dense<0.000000e+00> : vector<2x32xf32>
    %268 = tpu.matmul %258, %8, %cst_104 {dimension_numbers = #tpu.dot_dimension_numbers<[1], [0], [0], [1], [0, 0, 1, 1], [], []>} : vector<2x32xf32>, vector<32x32xf32>, vector<2x32xf32> -> vector<2x32xf32>
    %269 = vector.broadcast %14 : vector<1x32xf32> to vector<2x32xf32>
    %270 = arith.addf %268, %269 : vector<2x32xf32>
    %271 = arith.index_cast %c6_i32 : i32 to index
    %c0_105 = arith.constant 0 : index
    %c0_106 = arith.constant 0 : index
    %272 = vector.load %arg2[%271, %c0_105, %c0_106] : memref<8x2x32xf32, #tpu.memory_space<vmem>>, vector<1x2x32xf32>
    %273 = vector.shape_cast %272 : vector<1x2x32xf32> to vector<2x32xf32>
    %274 = arith.addf %273, %264 : vector<2x32xf32>
    %275 = arith.negf %274 : vector<2x32xf32>
    %276 = math.exp %275 : vector<2x32xf32>
    %cst_107 = arith.constant 1.000000e+00 : f32
    %277 = vector.broadcast %cst_107 : f32 to vector<2x32xf32>
    %278 = arith.addf %277, %276 : vector<2x32xf32>
    %279 = arith.divf %277, %278 : vector<2x32xf32>
    %280 = arith.index_cast %c6_i32 : i32 to index
    %c0_108 = arith.constant 0 : index
    %c0_109 = arith.constant 0 : index
    %281 = vector.load %arg3[%280, %c0_108, %c0_109] : memref<8x2x32xf32, #tpu.memory_space<vmem>>, vector<1x2x32xf32>
    %282 = vector.shape_cast %281 : vector<1x2x32xf32> to vector<2x32xf32>
    %283 = arith.addf %282, %267 : vector<2x32xf32>
    %284 = arith.negf %283 : vector<2x32xf32>
    %285 = math.exp %284 : vector<2x32xf32>
    %cst_110 = arith.constant 1.000000e+00 : f32
    %286 = vector.broadcast %cst_110 : f32 to vector<2x32xf32>
    %287 = arith.addf %286, %285 : vector<2x32xf32>
    %288 = arith.divf %286, %287 : vector<2x32xf32>
    %289 = arith.index_cast %c6_i32 : i32 to index
    %c0_111 = arith.constant 0 : index
    %c0_112 = arith.constant 0 : index
    %290 = vector.load %arg4[%289, %c0_111, %c0_112] : memref<8x2x32xf32, #tpu.memory_space<vmem>>, vector<1x2x32xf32>
    %291 = vector.shape_cast %290 : vector<1x2x32xf32> to vector<2x32xf32>
    %292 = arith.mulf %279, %270 : vector<2x32xf32>
    %293 = arith.addf %291, %292 : vector<2x32xf32>
    %294 = math.tanh %293 : vector<2x32xf32>
    %cst_113 = arith.constant 1.000000e+00 : f32
    %295 = vector.broadcast %cst_113 : f32 to vector<2x32xf32>
    %296 = arith.subf %295, %288 : vector<2x32xf32>
    %297 = arith.mulf %296, %294 : vector<2x32xf32>
    %298 = arith.mulf %288, %258 : vector<2x32xf32>
    %299 = arith.addf %297, %298 : vector<2x32xf32>
    %300 = vector.shape_cast %299 : vector<2x32xf32> to vector<2x1x32xf32>
    %c0_114 = arith.constant 0 : index
    %301 = arith.index_cast %c6_i32 : i32 to index
    %c0_115 = arith.constant 0 : index
    %302 = vector.load %arg8[%c0_114, %301, %c0_115] : memref<2x8x32xf32, #tpu.memory_space<vmem>>, vector<2x1x32xf32>
    tpu.vector_store %arg8[%c0_114, %301, %c0_115], %300 {strides = array<i32>} : memref<2x8x32xf32, #tpu.memory_space<vmem>>, vector<2x1x32xf32>,
    %c7_i32 = arith.constant 7 : i32
    %cst_116 = arith.constant dense<0.000000e+00> : vector<2x32xf32>
    %303 = tpu.matmul %299, %4, %cst_116 {dimension_numbers = #tpu.dot_dimension_numbers<[1], [0], [0], [1], [0, 0, 1, 1], [], []>} : vector<2x32xf32>, vector<32x32xf32>, vector<2x32xf32> -> vector<2x32xf32>
    %304 = vector.broadcast %10 : vector<1x32xf32> to vector<2x32xf32>
    %305 = arith.addf %303, %304 : vector<2x32xf32>
    %cst_117 = arith.constant dense<0.000000e+00> : vector<2x32xf32>
    %306 = tpu.matmul %299, %6, %cst_117 {dimension_numbers = #tpu.dot_dimension_numbers<[1], [0], [0], [1], [0, 0, 1, 1], [], []>} : vector<2x32xf32>, vector<32x32xf32>, vector<2x32xf32> -> vector<2x32xf32>
    %307 = vector.broadcast %12 : vector<1x32xf32> to vector<2x32xf32>
    %308 = arith.addf %306, %307 : vector<2x32xf32>
    %cst_118 = arith.constant dense<0.000000e+00> : vector<2x32xf32>
    %309 = tpu.matmul %299, %8, %cst_118 {dimension_numbers = #tpu.dot_dimension_numbers<[1], [0], [0], [1], [0, 0, 1, 1], [], []>} : vector<2x32xf32>, vector<32x32xf32>, vector<2x32xf32> -> vector<2x32xf32>
    %310 = vector.broadcast %14 : vector<1x32xf32> to vector<2x32xf32>
    %311 = arith.addf %309, %310 : vector<2x32xf32>
    %312 = arith.index_cast %c7_i32 : i32 to index
    %c0_119 = arith.constant 0 : index
    %c0_120 = arith.constant 0 : index
    %313 = vector.load %arg2[%312, %c0_119, %c0_120] : memref<8x2x32xf32, #tpu.memory_space<vmem>>, vector<1x2x32xf32>
    %314 = vector.shape_cast %313 : vector<1x2x32xf32> to vector<2x32xf32>
    %315 = arith.addf %314, %305 : vector<2x32xf32>
    %316 = arith.negf %315 : vector<2x32xf32>
    %317 = math.exp %316 : vector<2x32xf32>
    %cst_121 = arith.constant 1.000000e+00 : f32
    %318 = vector.broadcast %cst_121 : f32 to vector<2x32xf32>
    %319 = arith.addf %318, %317 : vector<2x32xf32>
    %320 = arith.divf %318, %319 : vector<2x32xf32>
    %321 = arith.index_cast %c7_i32 : i32 to index
    %c0_122 = arith.constant 0 : index
    %c0_123 = arith.constant 0 : index
    %322 = vector.load %arg3[%321, %c0_122, %c0_123] : memref<8x2x32xf32, #tpu.memory_space<vmem>>, vector<1x2x32xf32>
    %323 = vector.shape_cast %322 : vector<1x2x32xf32> to vector<2x32xf32>
    %324 = arith.addf %323, %308 : vector<2x32xf32>
    %325 = arith.negf %324 : vector<2x32xf32>
    %326 = math.exp %325 : vector<2x32xf32>
    %cst_124 = arith.constant 1.000000e+00 : f32
    %327 = vector.broadcast %cst_124 : f32 to vector<2x32xf32>
    %328 = arith.addf %327, %326 : vector<2x32xf32>
    %329 = arith.divf %327, %328 : vector<2x32xf32>
    %330 = arith.index_cast %c7_i32 : i32 to index
    %c0_125 = arith.constant 0 : index
    %c0_126 = arith.constant 0 : index
    %331 = vector.load %arg4[%330, %c0_125, %c0_126] : memref<8x2x32xf32, #tpu.memory_space<vmem>>, vector<1x2x32xf32>
    %332 = vector.shape_cast %331 : vector<1x2x32xf32> to vector<2x32xf32>
    %333 = arith.mulf %320, %311 : vector<2x32xf32>
    %334 = arith.addf %332, %333 : vector<2x32xf32>
    %335 = math.tanh %334 : vector<2x32xf32>
    %cst_127 = arith.constant 1.000000e+00 : f32
    %336 = vector.broadcast %cst_127 : f32 to vector<2x32xf32>
    %337 = arith.subf %336, %329 : vector<2x32xf32>
    %338 = arith.mulf %337, %335 : vector<2x32xf32>
    %339 = arith.mulf %329, %299 : vector<2x32xf32>
    %340 = arith.addf %338, %339 : vector<2x32xf32>
    %341 = vector.shape_cast %340 : vector<2x32xf32> to vector<2x1x32xf32>
    %c0_128 = arith.constant 0 : index
    %342 = arith.index_cast %c7_i32 : i32 to index
    %c0_129 = arith.constant 0 : index
    %343 = vector.load %arg8[%c0_128, %342, %c0_129] : memref<2x8x32xf32, #tpu.memory_space<vmem>>, vector<2x1x32xf32>
    tpu.vector_store %arg8[%c0_128, %342, %c0_129], %341 {strides = array<i32>} : memref<2x8x32xf32, #tpu.memory_space<vmem>>, vector<2x1x32xf32>,
    %c8_i32 = arith.constant 8 : i32
    %c0_130 = arith.constant 0 : index
    %c0_131 = arith.constant 0 : index
    %344 = vector.load %arg9[%c0_130, %c0_131] : memref<2x32xf32, #tpu.memory_space<vmem>>, vector<2x32xf32>
    tpu.vector_store %arg9[%c0_130, %c0_131], %340 {strides = array<i32>} : memref<2x32xf32, #tpu.memory_space<vmem>>, vector<2x32xf32>,
    return
  }
  func.func @transform_0(%arg0: i32, %arg1: i32) -> (i32, i32, i32) {
    %c0_i32 = arith.constant 0 : i32
    %c0_i32_0 = arith.constant 0 : i32
    return %arg1, %arg0, %c0_i32 : i32, i32, i32
  }
  func.func @transform_1(%arg0: i32, %arg1: i32) -> (i32, i32, i32) {
    %c0_i32 = arith.constant 0 : i32
    %c0_i32_0 = arith.constant 0 : i32
    return %arg1, %arg0, %c0_i32 : i32, i32, i32
  }
  func.func @transform_2(%arg0: i32, %arg1: i32) -> (i32, i32, i32) {
    %c0_i32 = arith.constant 0 : i32
    %c0_i32_0 = arith.constant 0 : i32
    return %arg1, %arg0, %c0_i32 : i32, i32, i32
  }
  func.func @transform_3(%arg0: i32, %arg1: i32) -> (i32, i32) {
    %c0_i32 = arith.constant 0 : i32
    %c0_i32_0 = arith.constant 0 : i32
    return %arg0, %c0_i32 : i32, i32
  }
  func.func @transform_4(%arg0: i32, %arg1: i32) -> (i32, i32, i32) {
    %c0_i32 = arith.constant 0 : i32
    %c0_i32_0 = arith.constant 0 : i32
    %c0_i32_1 = arith.constant 0 : i32
    %c0_i32_2 = arith.constant 0 : i32
    return %c0_i32, %c0_i32_0, %c0_i32_1 : i32, i32, i32
  }
  func.func @transform_5(%arg0: i32, %arg1: i32) -> (i32, i32, i32) {
    %c0_i32 = arith.constant 0 : i32
    %c0_i32_0 = arith.constant 0 : i32
    %c0_i32_1 = arith.constant 0 : i32
    %c0_i32_2 = arith.constant 0 : i32
    return %c0_i32, %c0_i32_0, %c0_i32_1 : i32, i32, i32
  }
  func.func @transform_6(%arg0: i32, %arg1: i32) -> (i32, i32, i32) {
    %c0_i32 = arith.constant 0 : i32
    %c0_i32_0 = arith.constant 0 : i32
    return %arg0, %arg1, %c0_i32 : i32, i32, i32
  }
  func.func @transform_7(%arg0: i32, %arg1: i32) -> (i32, i32) {
    %c0_i32 = arith.constant 0 : i32
    %c0_i32_0 = arith.constant 0 : i32
    return %arg0, %c0_i32 : i32, i32
  }
}

</mosaic_0001>

<bundles_post_ra>
// kernel: rnnlm_forward.5
= control target key start
LH: loop header
LB: loop body
LE: loop exit
PB: predicated region body
PF: predicated region fallthrough
CT: control target
= control target key end

     0   :  { %vm42_vm0 = vcmask 261120   ;;  %s121_s1 = inlined_call_operand.vmem [shape: bf16[32,128], index: 1, kind: input, shape index: {}]   ;;  %s122_s2 = inlined_call_operand.vmem [shape: f32[1,128], index: 2, kind: input, shape index: {}]   ;;  %s123_s0 = inlined_call_operand.vmem [shape: bf16[16,32], index: 0, kind: input, shape index: {}]   ;;  %s124_s3 = inlined_call_operand.vmem [shape: f32[16,128], index: 3, kind: output, shape index: {}]  }
   0x1   :  { %v81_v0 = vld [vmem:[%s121_s1 + $0x8] sm:$0xff]  ;;  %v80_v1 = vld [vmem:[%s121_s1] sm:$0xff] }
   0x2   :  { %52 = vmatpush.bf16.msra.mxu0 %v81_v0  ;;  %v79_v2 = vld [vmem:[%s123_s0] sm:$0xff] }
   0x3   :  { %v82_v3 = vld [vmem:[%s122_s2] ss:$0 sm:$0xff] }
   0x6   :  { %53 = vmatpush.bf16.msra.mxu0 %v80_v1 }
   0x9   :  { %78 = vmatmul.msk.bf16.vlgmr.msra.gmra.mxu0 %vm42_vm0, %v79_v2 }
  0x86   :  { %v55_v4 = vpop.f32.mrf.mxu0 }
  0x87   :  { %v56_v5 = vadd.f32 %v82_v3, %v55_v4 }
  0x89   :  { %60 = vst [vmem:[%s124_s3] sm:$0xff] %v56_v5 }
  0x8e   :  { %v57_v6 = vpop.f32.mrf.mxu0 }
  0x8f   :  { %v58_v7 = vadd.f32 %v82_v3, %v57_v6 }
  0x91   :  { %61 = vst [vmem:[%s124_s3 + $0x8] sm:$0xff] %v58_v7 }

// kernel: rnnlm_forward.8
= control target key start
LH: loop header
LB: loop body
LE: loop exit
PB: predicated region body
PF: predicated region fallthrough
CT: control target
= control target key end

     0   :  { %vm31_vm0 = vcmask 254976   ;;  %s1675_s0 = inlined_call_operand.vmem [shape: f32[8,2,32], index: 0, kind: input, shape index: {}]   ;;  %s1676_s1 = inlined_call_operand.vmem [shape: f32[8,2,32], index: 1, kind: input, shape index: {}]   ;;  %s1677_s2 = inlined_call_operand.vmem [shape: f32[8,2,32], index: 2, kind: input, shape index: {}]   ;;  %s1678_s3 = inlined_call_operand.vmem [shape: f32[2,32], index: 3, kind: input, shape index: {}]   ;;  %s1679_s4 = inlined_call_operand.vmem [shape: f32[3,32,32], index: 4, kind: input, shape index: {}]   ;;  %s1680_s5 = inlined_call_operand.vmem [shape: f32[3,1,32], index: 5, kind: input, shape index: {}]   ;;  %s1681_s6 = inlined_call_operand.vmem [shape: f32[2,8,32], index: 6, kind: output, shape index: {0}]   ;;  %s1682_s7 = inlined_call_operand.hbm [shape: f32[2,32], index: 7, kind: output, shape index: {1}]  }
   0x1   :  { %v1269_v0 = vld [vmem:[%s1679_s4 + $0x18] sm:$0xff]  ;;  %v1279_v2 = vld [vmem:[%s1679_s4 + $0x10] sm:$0xff]  ;;  %v1291_v4 = vld [vmem:[%s1679_s4 + $0x8] sm:$0xff] }
   0x2   :  { %v1274_v1 = vld [vmem:[%s1679_s4 + $0x38] sm:$0xff]  ;;  %72 = vmatpush.msra.mxu0 %v1269_v0  ;;  %v1286_v3 = vld [vmem:[%s1679_s4 + $0x30] sm:$0xff]  ;;  %v1296_v5 = vld [vmem:[%s1679_s4 + $0x28] sm:$0xff]  ;;  %196 = vmatpush.msra.mxu3 %v1269_v0 }
   0x3   :  { %95 = vmatpush.msra.mxu1 %v1274_v1  ;;  %v30_v6 = vld [vmem:[%s1678_s3] sm:$0x3]  ;;  %v1313_v8 = vld [vmem:[%s1679_s4 + $0x58] sm:$0xff]  ;;  %v1318_v9 = vld [vmem:[%s1679_s4 + $0x50] sm:$0xff] }
   0x4   :  { %73 = vmatpush.msra.mxu0 %v1279_v2  ;;  %v1307_v7 = vld [vmem:[%s1679_s4] sm:$0xff]  ;;  %32 = vst.msk [vmem:[#allocation2] sm:$0x3] %vm31_vm0, %v30_v6  ;;  %118 = vmatpush.msra.mxu2 %v1313_v8  ;;  %v1329_v11 = vld [vmem:[%s1679_s4 + $0x48] sm:$0xff] }
   0x5   :  { %96 = vmatpush.msra.mxu1 %v1286_v3  ;;  %v1323_v10 = vld [vmem:[%s1679_s4 + $0x20] sm:$0xff]  ;;  %197 = vmatpush.msra.mxu3 %v1279_v2 }
   0x6   :  { %74 = vmatpush.msra.mxu0 %v1291_v4 }
   0x7   :  { %97 = vmatpush.msra.mxu1 %v1296_v5 }
   0x8   :  { %13 = vsyncpa [#allocation3], 0  ;;  %119 = vmatpush.msra.mxu2 %v1318_v9  ;;  %198 = vmatpush.msra.mxu3 %v1291_v4  ;;  %v1341_v12 = vld [vmem:[%s1679_s4 + $0x40] sm:$0xff]  ;;  %vm56_vm1 = vcmask 261120   ;;  %vm179_vm10 = vcmask 253952   ;;  %s1225_s27 = smov [#allocation2]  }
   0x9   :  { %75 = vmatpush.msra.mxu0 %v1307_v7  ;;  %98 = vmatpush.msra.mxu1 %v1323_v10  ;;  %v1385_v14 = vld [vmem:[%s1680_s5] ss:$0 sm:$0xff]  ;;  %v1390_v15 = vld [vmem:[%s1680_s5 + $0x1] ss:$0 sm:$0xff]  ;;  %v1403_v34 = vld [vmem:[%s1680_s5 + $0x2] ss:$0 sm:$0xff] }
   0xa   :  { %120 = vmatpush.msra.mxu2 %v1329_v11  ;;  %199 = vmatpush.msra.mxu3 %v1307_v7  ;;  %v126_v17 = vld [vmem:[%s1675_s0] sm:$0x3]  ;;  %v1064_v63 = vld [vmem:[%s1676_s1 + $0x2] sm:$0x3]  ;;  %s1033_s30 = sshll.u32 %s1682_s7, 4  ;;  %s1034_s30 = int_to_ptr.hbm [resolvable:$true] %s1033_s30 }
   0xb   :  { %216 = vmatpush.msrb.mxu0 %v1274_v1  ;;  %236 = vmatpush.msrb.mxu1 %v1313_v8  ;;  %v1347_v13 = vld [vmem:[#allocation2] sm:$0x3] }
   0xc   :  { %121 = vmatpush.msra.mxu2 %v1341_v12  ;;  %1054 = vmatmul.msk.f32.vlgmr.msra.gmra.mxu0 %vm56_vm1, %v1347_v13  ;;  %v147_v19 = vld [vmem:[%s1676_s1] sm:$0x3] }
   0xd   :  { %217 = vmatpush.msrb.mxu0 %v1286_v3  ;;  %1055 = vmatmul.msk.f32.vlgmr.msra.gmra.mxu1 %vm56_vm1, %v1347_v13  ;;  %v168_v48 = vld [vmem:[%s1677_s2] sm:$0x3] }
   0xe   :  { %1056 = vmatmul.msk.f32.vlgmr.msra.gmra.mxu2 %vm56_vm1, %v1347_v13  ;;  %237 = vmatpush.msrb.mxu1 %v1318_v9 }
   0xf   :  { %218 = vmatpush.msrb.mxu0 %v1296_v5  ;;  %316 = vmatpush.msrb.mxu2 %v1269_v0 }
  0x10   :  { %238 = vmatpush.msrb.mxu1 %v1329_v11  ;;  %336 = vmatpush.msrb.mxu3 %v1274_v1 }
  0x11   :  { %219 = vmatpush.msrb.mxu0 %v1323_v10  ;;  %317 = vmatpush.msrb.mxu2 %v1279_v2 }
  0x12   :  { %239 = vmatpush.msrb.mxu1 %v1341_v12  ;;  %337 = vmatpush.msrb.mxu3 %v1286_v3 }
  0x13   :  { %356 = vmatpush.msra.mxu0 %v1313_v8  ;;  %318 = vmatpush.msrb.mxu2 %v1291_v4 }
  0x14   :  { %436 = vmatpush.msra.mxu1 %v1269_v0  ;;  %338 = vmatpush.msrb.mxu3 %v1296_v5 }
  0x15   :  { %357 = vmatpush.msra.mxu0 %v1318_v9  ;;  %319 = vmatpush.msrb.mxu2 %v1307_v7 }
  0x16   :  { %339 = vmatpush.msrb.mxu3 %v1323_v10  ;;  %437 = vmatpush.msra.mxu1 %v1279_v2 }
  0x17   :  { %358 = vmatpush.msra.mxu0 %v1329_v11  ;;  %456 = vmatpush.msra.mxu2 %v1274_v1 }
  0x18   :  { %438 = vmatpush.msra.mxu1 %v1291_v4 }
  0x19   :  { %359 = vmatpush.msra.mxu0 %v1341_v12  ;;  %457 = vmatpush.msra.mxu2 %v1286_v3 }
  0x1a   :  { %439 = vmatpush.msra.mxu1 %v1307_v7 }
  0x1b   :  { %458 = vmatpush.msra.mxu2 %v1296_v5 }
  0x1d   :  { %459 = vmatpush.msra.mxu2 %v1323_v10 }
  0x89   :  { %v77_v16 = vpop.f32.mrf.mxu0 }
  0x8a   :  { %v100_v18 = vpop.f32.mrf.mxu1  ;;  %v78_v20 = vadd.f32 %v1385_v14, %v77_v16 }
  0x8b   :  { %v101_v21 = vadd.f32 %v1390_v15, %v100_v18  ;;  %v1062_v18 = vld [vmem:[%s1675_s0 + $0x2] sm:$0x3] }
  0x8c   :  { %v127_v22 = vadd.f32 %v126_v17, %v78_v20 }
  0x8d   :  { %v148_v23 = vadd.f32 %v147_v19, %v101_v21 }
  0x8e   :  { %v1057_v24 = vmul.f32 -1.442695, %v127_v22 }
  0x8f   :  { %v1058_v25 = vmul.f32 -1.442695, %v148_v23 }
  0x90   :  { %1119 = vpow2.f32 %v1057_v24 }
  0x91   :  { %1121 = vpow2.f32 %v1058_v25  ;;  %v123_v37 = vpop.f32.mrf.mxu2 }
  0x92   :  { %v124_v42 = vadd.f32 %v1403_v34, %v123_v37 }
  0x96   :  { %v1120_v26 = vpop.eup %1119 }
  0x97   :  { %v1122_v27 = vpop.eup %1121  ;;  %v131_v28 = vadd.f32 1.0, %v1120_v26 }
  0x98   :  { %v152_v29 = vadd.f32 1.0, %v1122_v27 }
  0x99   :  { %1123 = vrcp.f32 %v131_v28  ;;  %v143_v38 = vand.u32 2147483648, %v131_v28  ;;  %v141_v40 = vand.u32 2147483647, %v131_v28  ;;  %vm137_vm3 = vweird.f32 %v131_v28 }
  0x9a   :  { %1125 = vrcp.f32 %v152_v29  ;;  %vm158_vm6 = vweird.f32 %v152_v29  ;;  %v164_v49 = vand.u32 2147483648, %v152_v29  ;;  %v162_v51 = vand.u32 2147483647, %v152_v29 }
  0x9b   :  { %v144_v44 = vor.u32 1.1754944e-38, %v143_v38  ;;  %vm142_vm5 = vcmp.eq.f32.partialorder %v141_v40, 8.507059e+37 }
  0x9c   :  { %v165_v54 = vor.u32 1.1754944e-38, %v164_v49  ;;  %vm163_vm9 = vcmp.eq.f32.partialorder %v162_v51, 8.507059e+37 }
  0x9f   :  { %v1124_v30 = vpop.eup %1123 }
  0xa0   :  { %v1126_v31 = vpop.eup %1125  ;;  %v133_v32 = vmul.f32 %v1124_v30, %v131_v28  ;;  %vm138_vm2 = vweird.f32 %v1124_v30 }
  0xa1   :  { %v154_v33 = vmul.f32 %v1126_v31, %v152_v29  ;;  %vm139_vm4 = vmor %vm137_vm3, %vm138_vm2  ;;  %vm159_vm7 = vweird.f32 %v1126_v31 }
  0xa2   :  { %v134_v35 = vsub.f32 1.0, %v133_v32  ;;  %vm160_vm8 = vmor %vm158_vm6, %vm159_vm7 }
  0xa3   :  { %v155_v36 = vsub.f32 1.0, %v154_v33 }
  0xa4   :  { %v135_v39 = vmul.f32 %v1124_v30, %v134_v35 }
  0xa5   :  { %v156_v41 = vmul.f32 %v1126_v31, %v155_v36 }
  0xa6   :  { %v136_v43 = vadd.f32 %v1124_v30, %v135_v39 }
  0xa7   :  { %v157_v47 = vadd.f32 %v1126_v31, %v156_v41 }
  0xa8   :  { %v140_v45 = vsel %vm139_vm4, %v1124_v30, %v136_v43 }
  0xa9   :  { %v145_v46 = vsel %vm142_vm5, %v144_v44, %v140_v45  ;;  %v161_v53 = vsel %vm160_vm8, %v1126_v31, %v157_v47  ;;  %v1066_v44 = vld [vmem:[%s1677_s2 + $0x2] sm:$0x3] }
  0xaa   :  { %v169_v50 = vmul.f32 %v145_v46, %v124_v42  ;;  %v166_v55 = vsel %vm163_vm9, %v165_v54, %v161_v53 }
  0xab   :  { %v172_v56 = vsub.f32 1.0, %v166_v55  ;;  %v174_v59 = vmul.f32 %v166_v55, %v1347_v13 }
  0xac   :  { %v170_v52 = vadd.f32 %v169_v50, %v168_v48 }
  0xae   :  { %1127 = vtanh.f32 %v170_v52 }
  0xb4   :  { %v1128_v57 = vpop.eup %1127 }
  0xb5   :  { %v173_v58 = vmul.f32 %v1128_v57, %v172_v56 }
  0xb7   :  { %v1410_v60 = vadd.f32 %v174_v59, %v173_v58  ;;  %v1070_v59 = vld [vmem:[%s1675_s0 + $0x4] sm:$0x3] }
  0xb9   :  { %v177_v61 = vrot.slane %v1410_v60, 1  ;;  %180 = vst.msk [vmem:[%s1681_s6] sm:$0x1] %vm179_vm10, %v1410_v60  ;;  %1059 = vmatmul.msk.f32.vlgmr.msra.gmra.mxu3 %vm56_vm1, %v1410_v60  ;;  %1060 = vmatmul.msk.f32.vlgmr.msrb.gmra.mxu0 %vm56_vm1, %v1410_v60 }
  0xba   :  { %1061 = vmatmul.msk.f32.vlgmr.msrb.gmra.mxu1 %vm56_vm1, %v1410_v60  ;;  %476 = vmatpush.msra.mxu3 %v1313_v8 }
  0xbb   :  { %181 = vst.msk [vmem:[%s1681_s6 + $0x8] sm:$0x1] %vm179_vm10, %v177_v61  ;;  %556 = vmatpush.msrb.mxu0 %v1269_v0  ;;  %576 = vmatpush.msrb.mxu1 %v1274_v1  ;;  %v1072_v61 = vld [vmem:[%s1676_s1 + $0x4] sm:$0x3] }
  0xbc   :  { %477 = vmatpush.msra.mxu3 %v1318_v9 }
  0xbd   :  { %557 = vmatpush.msrb.mxu0 %v1279_v2  ;;  %577 = vmatpush.msrb.mxu1 %v1286_v3 }
  0xbe   :  { %478 = vmatpush.msra.mxu3 %v1329_v11 }
  0xbf   :  { %558 = vmatpush.msrb.mxu0 %v1291_v4  ;;  %578 = vmatpush.msrb.mxu1 %v1296_v5 }
  0xc0   :  { %479 = vmatpush.msra.mxu3 %v1341_v12 }
  0xc1   :  { %559 = vmatpush.msrb.mxu0 %v1307_v7  ;;  %579 = vmatpush.msrb.mxu1 %v1323_v10 }
 0x136   :  { %v221_v62 = vpop.f32.mrf.mxu0 }
 0x137   :  { %v222_v6 = vadd.f32 %v1390_v15, %v221_v62  ;;  %v241_v37 = vpop.f32.mrf.mxu1 }
 0x138   :  { %v242_v40 = vadd.f32 %v1403_v34, %v241_v37 }
 0x139   :  { %v268_v13 = vadd.f32 %v1064_v63, %v222_v6 }
 0x13b   :  { %v1065_v16 = vmul.f32 -1.442695, %v268_v13 }
 0x13c   :  { %v201_v17 = vpop.f32.mrf.mxu3 }
 0x13d   :  { %1129 = vpow2.f32 %v1065_v16  ;;  %v202_v19 = vadd.f32 %v1385_v14, %v201_v17 }
 0x13f   :  { %v246_v20 = vadd.f32 %v1062_v18, %v202_v19 }
 0x141   :  { %v1063_v21 = vmul.f32 -1.442695, %v246_v20 }
 0x143   :  { %v1130_v22 = vpop.eup %1129  ;;  %1131 = vpow2.f32 %v1063_v21 }
 0x144   :  { %v272_v23 = vadd.f32 1.0, %v1130_v22 }
 0x146   :  { %1133 = vrcp.f32 %v272_v23  ;;  %v284_v45 = vand.u32 2147483648, %v272_v23  ;;  %vm278_vm2 = vweird.f32 %v272_v23  ;;  %v282_v47 = vand.u32 2147483647, %v272_v23 }
 0x148   :  { %v285_v50 = vor.u32 1.1754944e-38, %v284_v45  ;;  %vm283_vm4 = vcmp.eq.f32.partialorder %v282_v47, 8.507059e+37 }
 0x149   :  { %v1132_v24 = vpop.eup %1131 }
 0x14a   :  { %v250_v25 = vadd.f32 1.0, %v1132_v24 }
 0x14c   :  { %1135 = vrcp.f32 %v250_v25  ;;  %v1134_v26 = vpop.eup %1133  ;;  %v262_v32 = vand.u32 2147483648, %v250_v25  ;;  %v260_v35 = vand.u32 2147483647, %v250_v25  ;;  %vm256_vm12 = vweird.f32 %v250_v25 }
 0x14d   :  { %v274_v27 = vmul.f32 %v1134_v26, %v272_v23  ;;  %vm279_vm15 = vweird.f32 %v1134_v26 }
 0x14e   :  { %v263_v39 = vor.u32 1.1754944e-38, %v262_v32  ;;  %vm261_vm14 = vcmp.eq.f32.partialorder %v260_v35, 8.507059e+37  ;;  %vm280_vm3 = vmor %vm278_vm2, %vm279_vm15 }
 0x14f   :  { %v275_v30 = vsub.f32 1.0, %v274_v27 }
 0x151   :  { %v276_v36 = vmul.f32 %v1134_v26, %v275_v30 }
 0x152   :  { %v1136_v28 = vpop.eup %1135 }
 0x153   :  { %v252_v29 = vmul.f32 %v1136_v28, %v250_v25  ;;  %vm257_vm11 = vweird.f32 %v1136_v28  ;;  %v277_v42 = vadd.f32 %v1134_v26, %v276_v36 }
 0x154   :  { %vm258_vm13 = vmor %vm256_vm12, %vm257_vm11 }
 0x155   :  { %v253_v31 = vsub.f32 1.0, %v252_v29  ;;  %v281_v49 = vsel %vm280_vm3, %v1134_v26, %v277_v42 }
 0x156   :  { %v286_v51 = vsel %vm283_vm4, %v285_v50, %v281_v49 }
 0x157   :  { %v254_v33 = vmul.f32 %v1136_v28, %v253_v31  ;;  %v293_v52 = vsub.f32 1.0, %v286_v51  ;;  %v295_v55 = vmul.f32 %v286_v51, %v1410_v60 }
 0x159   :  { %v255_v38 = vadd.f32 %v1136_v28, %v254_v33 }
 0x15b   :  { %v259_v41 = vsel %vm258_vm13, %v1136_v28, %v255_v38 }
 0x15c   :  { %v264_v43 = vsel %vm261_vm14, %v263_v39, %v259_v41  ;;  %v1074_v39 = vld [vmem:[%s1677_s2 + $0x4] sm:$0x3] }
 0x15d   :  { %v290_v46 = vmul.f32 %v264_v43, %v242_v40 }
 0x15f   :  { %v291_v48 = vadd.f32 %v1066_v44, %v290_v46 }
 0x161   :  { %1137 = vtanh.f32 %v291_v48 }
 0x167   :  { %v1138_v53 = vpop.eup %1137 }
 0x168   :  { %v294_v54 = vmul.f32 %v1138_v53, %v293_v52 }
 0x16a   :  { %v1453_v56 = vadd.f32 %v295_v55, %v294_v54  ;;  %v1078_v55 = vld [vmem:[%s1675_s0 + $0x6] sm:$0x3] }
 0x16c   :  { %v298_v57 = vrot.slane %v1453_v56, 1  ;;  %300 = vst.msk [vmem:[%s1681_s6 + $0x1] sm:$0x1] %vm179_vm10, %v1453_v56  ;;  %1067 = vmatmul.msk.f32.vlgmr.msrb.gmra.mxu2 %vm56_vm1, %v1453_v56  ;;  %1068 = vmatmul.msk.f32.vlgmr.msrb.gmra.mxu3 %vm56_vm1, %v1453_v56 }
 0x16d   :  { %1069 = vmatmul.msk.f32.vlgmr.msra.gmra.mxu0 %vm56_vm1, %v1453_v56  ;;  %596 = vmatpush.msrb.mxu2 %v1313_v8 }
 0x16e   :  { %301 = vst.msk [vmem:[%s1681_s6 + $0x9] sm:$0x1] %vm179_vm10, %v298_v57  ;;  %676 = vmatpush.msrb.mxu3 %v1269_v0  ;;  %696 = vmatpush.msra.mxu0 %v1274_v1 }
 0x16f   :  { %597 = vmatpush.msrb.mxu2 %v1318_v9 }
 0x170   :  { %677 = vmatpush.msrb.mxu3 %v1279_v2  ;;  %697 = vmatpush.msra.mxu0 %v1286_v3 }
 0x171   :  { %598 = vmatpush.msrb.mxu2 %v1329_v11 }
 0x172   :  { %678 = vmatpush.msrb.mxu3 %v1291_v4  ;;  %698 = vmatpush.msra.mxu0 %v1296_v5 }
 0x173   :  { %599 = vmatpush.msrb.mxu2 %v1341_v12 }
 0x174   :  { %679 = vmatpush.msrb.mxu3 %v1307_v7  ;;  %699 = vmatpush.msra.mxu0 %v1323_v10 }
 0x1ea   :  { %v361_v31 = vpop.f32.mrf.mxu0 }
 0x1eb   :  { %v362_v36 = vadd.f32 %v1403_v34, %v361_v31 }
 0x1ef   :  { %v321_v58 = vpop.f32.mrf.mxu2  ;;  %v341_v60 = vpop.f32.mrf.mxu3 }
 0x1f0   :  { %v322_v62 = vadd.f32 %v1385_v14, %v321_v58  ;;  %v342_v63 = vadd.f32 %v1390_v15, %v341_v60  ;;  %v1080_v60 = vld [vmem:[%s1676_s1 + $0x6] sm:$0x3] }
 0x1f2   :  { %v366_v6 = vadd.f32 %v1070_v59, %v322_v62  ;;  %v388_v13 = vadd.f32 %v1072_v61, %v342_v63 }
 0x1f4   :  { %v1071_v16 = vmul.f32 -1.442695, %v366_v6  ;;  %v1073_v17 = vmul.f32 -1.442695, %v388_v13 }
 0x1f6   :  { %1139 = vpow2.f32 %v1071_v16 }
 0x1f7   :  { %1141 = vpow2.f32 %v1073_v17 }
 0x1fc   :  { %v1140_v18 = vpop.eup %1139 }
 0x1fd   :  { %v1142_v19 = vpop.eup %1141  ;;  %v370_v20 = vadd.f32 1.0, %v1140_v18 }
 0x1fe   :  { %v392_v21 = vadd.f32 1.0, %v1142_v19 }
 0x1ff   :  { %1143 = vrcp.f32 %v370_v20  ;;  %v382_v27 = vand.u32 2147483648, %v370_v20  ;;  %v380_v30 = vand.u32 2147483647, %v370_v20  ;;  %vm376_vm6 = vweird.f32 %v370_v20 }
 0x200   :  { %1145 = vrcp.f32 %v392_v21  ;;  %v404_v42 = vand.u32 2147483648, %v392_v21  ;;  %vm398_vm11 = vweird.f32 %v392_v21  ;;  %v402_v43 = vand.u32 2147483647, %v392_v21 }
 0x201   :  { %v383_v35 = vor.u32 1.1754944e-38, %v382_v27  ;;  %vm381_vm8 = vcmp.eq.f32.partialorder %v380_v30, 8.507059e+37 }
 0x202   :  { %v405_v46 = vor.u32 1.1754944e-38, %v404_v42  ;;  %vm403_vm13 = vcmp.eq.f32.partialorder %v402_v43, 8.507059e+37 }
 0x205   :  { %v1144_v22 = vpop.eup %1143 }
 0x206   :  { %v1146_v23 = vpop.eup %1145  ;;  %v372_v24 = vmul.f32 %v1144_v22, %v370_v20  ;;  %vm377_vm5 = vweird.f32 %v1144_v22 }
 0x207   :  { %v394_v25 = vmul.f32 %v1146_v23, %v392_v21  ;;  %vm378_vm7 = vmor %vm376_vm6, %vm377_vm5  ;;  %vm399_vm9 = vweird.f32 %v1146_v23 }
 0x208   :  { %v373_v26 = vsub.f32 1.0, %v372_v24  ;;  %vm400_vm12 = vmor %vm398_vm11, %vm399_vm9 }
 0x209   :  { %v395_v28 = vsub.f32 1.0, %v394_v25 }
 0x20a   :  { %v374_v29 = vmul.f32 %v1144_v22, %v373_v26 }
 0x20b   :  { %v396_v32 = vmul.f32 %v1146_v23, %v395_v28 }
 0x20c   :  { %v375_v33 = vadd.f32 %v1144_v22, %v374_v29 }
 0x20d   :  { %v397_v40 = vadd.f32 %v1146_v23, %v396_v32 }
 0x20e   :  { %v379_v37 = vsel %vm378_vm7, %v1144_v22, %v375_v33  ;;  %v1082_v33 = vld [vmem:[%s1677_s2 + $0x6] sm:$0x3] }
 0x20f   :  { %v384_v38 = vsel %vm381_vm8, %v383_v35, %v379_v37  ;;  %v401_v45 = vsel %vm400_vm12, %v1146_v23, %v397_v40 }
 0x210   :  { %v410_v41 = vmul.f32 %v384_v38, %v362_v36  ;;  %v406_v47 = vsel %vm403_vm13, %v405_v46, %v401_v45 }
 0x211   :  { %v413_v48 = vsub.f32 1.0, %v406_v47  ;;  %v415_v51 = vmul.f32 %v406_v47, %v1453_v56 }
 0x212   :  { %v411_v44 = vadd.f32 %v1074_v39, %v410_v41 }
 0x214   :  { %1147 = vtanh.f32 %v411_v44 }
 0x21a   :  { %v1148_v49 = vpop.eup %1147 }
 0x21b   :  { %v414_v50 = vmul.f32 %v1148_v49, %v413_v48 }
 0x21d   :  { %v1496_v52 = vadd.f32 %v415_v51, %v414_v50 }
 0x21f   :  { %v418_v53 = vrot.slane %v1496_v52, 1  ;;  %420 = vst.msk [vmem:[%s1681_s6 + $0x2] sm:$0x1] %vm179_vm10, %v1496_v52  ;;  %1075 = vmatmul.msk.f32.vlgmr.msra.gmra.mxu1 %vm56_vm1, %v1496_v52  ;;  %1076 = vmatmul.msk.f32.vlgmr.msra.gmra.mxu2 %vm56_vm1, %v1496_v52 }
 0x220   :  { %1077 = vmatmul.msk.f32.vlgmr.msra.gmra.mxu3 %vm56_vm1, %v1496_v52  ;;  %716 = vmatpush.msra.mxu1 %v1313_v8 }
 0x221   :  { %421 = vst.msk [vmem:[%s1681_s6 + $0xa] sm:$0x1] %vm179_vm10, %v418_v53  ;;  %796 = vmatpush.msra.mxu2 %v1269_v0  ;;  %816 = vmatpush.msra.mxu3 %v1274_v1 }
 0x222   :  { %717 = vmatpush.msra.mxu1 %v1318_v9 }
 0x223   :  { %797 = vmatpush.msra.mxu2 %v1279_v2  ;;  %817 = vmatpush.msra.mxu3 %v1286_v3 }
 0x224   :  { %718 = vmatpush.msra.mxu1 %v1329_v11 }
 0x225   :  { %798 = vmatpush.msra.mxu2 %v1291_v4  ;;  %818 = vmatpush.msra.mxu3 %v1296_v5 }
 0x226   :  { %719 = vmatpush.msra.mxu1 %v1341_v12 }
 0x227   :  { %799 = vmatpush.msra.mxu2 %v1307_v7  ;;  %819 = vmatpush.msra.mxu3 %v1323_v10 }
 0x29c   :  { %v441_v54 = vpop.f32.mrf.mxu1 }
 0x29d   :  { %v442_v56 = vadd.f32 %v1385_v14, %v441_v54 }
 0x29f   :  { %v486_v57 = vadd.f32 %v1078_v55, %v442_v56 }
 0x2a1   :  { %v1079_v58 = vmul.f32 -1.442695, %v486_v57 }
 0x2a2   :  { %v461_v59 = vpop.f32.mrf.mxu2 }
 0x2a3   :  { %1149 = vpow2.f32 %v1079_v58  ;;  %v462_v61 = vadd.f32 %v1390_v15, %v461_v59  ;;  %v481_v25 = vpop.f32.mrf.mxu3 }
 0x2a4   :  { %v482_v30 = vadd.f32 %v1403_v34, %v481_v25 }
 0x2a5   :  { %v508_v62 = vadd.f32 %v1080_v60, %v462_v61 }
 0x2a7   :  { %v1081_v63 = vmul.f32 -1.442695, %v508_v62 }
 0x2a9   :  { %v1150_v6 = vpop.eup %1149  ;;  %1151 = vpow2.f32 %v1081_v63 }
 0x2aa   :  { %v490_v13 = vadd.f32 1.0, %v1150_v6 }
 0x2ac   :  { %1153 = vrcp.f32 %v490_v13  ;;  %v502_v21 = vand.u32 2147483648, %v490_v13  ;;  %v500_v23 = vand.u32 2147483647, %v490_v13  ;;  %vm496_vm15 = vweird.f32 %v490_v13 }
 0x2ae   :  { %v503_v28 = vor.u32 1.1754944e-38, %v502_v21  ;;  %vm501_vm3 = vcmp.eq.f32.partialorder %v500_v23, 8.507059e+37  ;;  %v1090_v23 = vld [vmem:[%s1677_s2 + $0x8] sm:$0x3] }
 0x2af   :  { %v1152_v16 = vpop.eup %1151 }
 0x2b0   :  { %v512_v17 = vadd.f32 1.0, %v1152_v16 }
 0x2b2   :  { %v1154_v18 = vpop.eup %1153  ;;  %1155 = vrcp.f32 %v512_v17  ;;  %v524_v36 = vand.u32 2147483648, %v512_v17  ;;  %v522_v38 = vand.u32 2147483647, %v512_v17  ;;  %vm518_vm5 = vweird.f32 %v512_v17 }
 0x2b3   :  { %v492_v19 = vmul.f32 %v1154_v18, %v490_v13  ;;  %vm497_vm14 = vweird.f32 %v1154_v18 }
 0x2b4   :  { %vm498_vm2 = vmor %vm496_vm15, %vm497_vm14  ;;  %v525_v41 = vor.u32 1.1754944e-38, %v524_v36  ;;  %vm523_vm7 = vcmp.eq.f32.partialorder %v522_v38, 8.507059e+37 }
 0x2b5   :  { %v493_v20 = vsub.f32 1.0, %v492_v19 }
 0x2b7   :  { %v494_v22 = vmul.f32 %v1154_v18, %v493_v20 }
 0x2b8   :  { %v1156_v24 = vpop.eup %1155 }
 0x2b9   :  { %v514_v26 = vmul.f32 %v1156_v24, %v512_v17  ;;  %v495_v27 = vadd.f32 %v1154_v18, %v494_v22  ;;  %vm519_vm4 = vweird.f32 %v1156_v24 }
 0x2ba   :  { %vm520_vm6 = vmor %vm518_vm5, %vm519_vm4 }
 0x2bb   :  { %v515_v29 = vsub.f32 1.0, %v514_v26  ;;  %v499_v31 = vsel %vm498_vm2, %v1154_v18, %v495_v27 }
 0x2bc   :  { %v504_v32 = vsel %vm501_vm3, %v503_v28, %v499_v31 }
 0x2bd   :  { %v516_v35 = vmul.f32 %v1156_v24, %v515_v29  ;;  %v530_v37 = vmul.f32 %v504_v32, %v482_v30 }
 0x2bf   :  { %v517_v39 = vadd.f32 %v1156_v24, %v516_v35  ;;  %v531_v40 = vadd.f32 %v1082_v33, %v530_v37 }
 0x2c1   :  { %v521_v42 = vsel %vm520_vm6, %v1156_v24, %v517_v39  ;;  %1157 = vtanh.f32 %v531_v40  ;;  %v1096_v39 = vld [vmem:[%s1676_s1 + $0xa] sm:$0x3] }
 0x2c2   :  { %v526_v43 = vsel %vm523_vm7, %v525_v41, %v521_v42 }
 0x2c3   :  { %v533_v44 = vsub.f32 1.0, %v526_v43  ;;  %v535_v47 = vmul.f32 %v526_v43, %v1496_v52  ;;  %v1094_v43 = vld [vmem:[%s1675_s0 + $0xa] sm:$0x3] }
 0x2c7   :  { %v1158_v45 = vpop.eup %1157 }
 0x2c8   :  { %v534_v46 = vmul.f32 %v1158_v45, %v533_v44 }
 0x2ca   :  { %v1539_v48 = vadd.f32 %v535_v47, %v534_v46 }
 0x2cc   :  { %v538_v49 = vrot.slane %v1539_v48, 1  ;;  %540 = vst.msk [vmem:[%s1681_s6 + $0x3] sm:$0x1] %vm179_vm10, %v1539_v48  ;;  %1083 = vmatmul.msk.f32.vlgmr.msrb.gmra.mxu0 %vm56_vm1, %v1539_v48  ;;  %1084 = vmatmul.msk.f32.vlgmr.msrb.gmra.mxu1 %vm56_vm1, %v1539_v48 }
 0x2cd   :  { %1085 = vmatmul.msk.f32.vlgmr.msrb.gmra.mxu2 %vm56_vm1, %v1539_v48  ;;  %836 = vmatpush.msrb.mxu0 %v1313_v8 }
 0x2ce   :  { %541 = vst.msk [vmem:[%s1681_s6 + $0xb] sm:$0x1] %vm179_vm10, %v538_v49  ;;  %916 = vmatpush.msrb.mxu1 %v1269_v0  ;;  %936 = vmatpush.msrb.mxu2 %v1274_v1  ;;  %v1086_v1 = vld [vmem:[%s1675_s0 + $0x8] sm:$0x3] }
 0x2cf   :  { %837 = vmatpush.msrb.mxu0 %v1318_v9 }
 0x2d0   :  { %917 = vmatpush.msrb.mxu1 %v1279_v2  ;;  %937 = vmatpush.msrb.mxu2 %v1286_v3  ;;  %v1088_v3 = vld [vmem:[%s1676_s1 + $0x8] sm:$0x3] }
 0x2d1   :  { %838 = vmatpush.msrb.mxu0 %v1329_v11 }
 0x2d2   :  { %918 = vmatpush.msrb.mxu1 %v1291_v4  ;;  %938 = vmatpush.msrb.mxu2 %v1296_v5 }
 0x2d3   :  { %839 = vmatpush.msrb.mxu0 %v1341_v12 }
 0x2d4   :  { %919 = vmatpush.msrb.mxu1 %v1307_v7  ;;  %939 = vmatpush.msrb.mxu2 %v1323_v10 }
 0x349   :  { %v561_v0 = vpop.f32.mrf.mxu0  ;;  %v581_v2 = vpop.f32.mrf.mxu1 }
 0x34a   :  { %v562_v4 = vadd.f32 %v1385_v14, %v561_v0  ;;  %v582_v5 = vadd.f32 %v1390_v15, %v581_v2 }
 0x34c   :  { %v606_v50 = vadd.f32 %v1086_v1, %v562_v4  ;;  %v628_v51 = vadd.f32 %v1088_v3, %v582_v5 }
 0x34e   :  { %v1087_v52 = vmul.f32 -1.442695, %v606_v50  ;;  %v1089_v7 = vmul.f32 -1.442695, %v628_v51 }
 0x350   :  { %1159 = vpow2.f32 %v1087_v52  ;;  %v601_v16 = vpop.f32.mrf.mxu2 }
 0x351   :  { %1161 = vpow2.f32 %v1089_v7  ;;  %v602_v19 = vadd.f32 %v1403_v34, %v601_v16 }
 0x356   :  { %v1160_v10 = vpop.eup %1159 }
 0x357   :  { %v1162_v53 = vpop.eup %1161  ;;  %v610_v54 = vadd.f32 1.0, %v1160_v10 }
 0x358   :  { %v632_v55 = vadd.f32 1.0, %v1162_v53 }
 0x359   :  { %1163 = vrcp.f32 %v610_v54  ;;  %v622_v62 = vand.u32 2147483648, %v610_v54  ;;  %v620_v6 = vand.u32 2147483647, %v610_v54  ;;  %vm616_vm9 = vweird.f32 %v610_v54 }
 0x35a   :  { %1165 = vrcp.f32 %v632_v55  ;;  %v644_v24 = vand.u32 2147483648, %v632_v55  ;;  %vm638_vm14 = vweird.f32 %v632_v55  ;;  %v642_v26 = vand.u32 2147483647, %v632_v55 }
 0x35b   :  { %v623_v18 = vor.u32 1.1754944e-38, %v622_v62  ;;  %vm621_vm12 = vcmp.eq.f32.partialorder %v620_v6, 8.507059e+37 }
 0x35c   :  { %v645_v29 = vor.u32 1.1754944e-38, %v644_v24  ;;  %vm643_vm2 = vcmp.eq.f32.partialorder %v642_v26, 8.507059e+37  ;;  %v1104_v24 = vld [vmem:[%s1676_s1 + $0xc] sm:$0x3] }
 0x35f   :  { %v1164_v56 = vpop.eup %1163 }
 0x360   :  { %v1166_v57 = vpop.eup %1165  ;;  %v612_v58 = vmul.f32 %v1164_v56, %v610_v54  ;;  %vm617_vm8 = vweird.f32 %v1164_v56 }
 0x361   :  { %v634_v59 = vmul.f32 %v1166_v57, %v632_v55  ;;  %vm618_vm11 = vmor %vm616_vm9, %vm617_vm8  ;;  %vm639_vm13 = vweird.f32 %v1166_v57 }
 0x362   :  { %v613_v60 = vsub.f32 1.0, %v612_v58  ;;  %vm640_vm15 = vmor %vm638_vm14, %vm639_vm13 }
 0x363   :  { %v635_v61 = vsub.f32 1.0, %v634_v59 }
 0x364   :  { %v614_v63 = vmul.f32 %v1164_v56, %v613_v60 }
 0x365   :  { %v636_v13 = vmul.f32 %v1166_v57, %v635_v61 }
 0x366   :  { %v615_v17 = vadd.f32 %v1164_v56, %v614_v63 }
 0x367   :  { %v637_v22 = vadd.f32 %v1166_v57, %v636_v13 }
 0x368   :  { %v619_v20 = vsel %vm618_vm11, %v1164_v56, %v615_v17 }
 0x369   :  { %v624_v21 = vsel %vm621_vm12, %v623_v18, %v619_v20  ;;  %v641_v28 = vsel %vm640_vm15, %v1166_v57, %v637_v22  ;;  %v1098_v57 = vld [vmem:[%s1677_s2 + $0xa] sm:$0x3]  ;;  %v1102_v22 = vld [vmem:[%s1675_s0 + $0xc] sm:$0x3] }
 0x36a   :  { %v650_v25 = vmul.f32 %v624_v21, %v602_v19  ;;  %v646_v30 = vsel %vm643_vm2, %v645_v29, %v641_v28 }
 0x36b   :  { %v653_v31 = vsub.f32 1.0, %v646_v30  ;;  %v655_v35 = vmul.f32 %v646_v30, %v1539_v48 }
 0x36c   :  { %v651_v27 = vadd.f32 %v1090_v23, %v650_v25 }
 0x36e   :  { %1167 = vtanh.f32 %v651_v27 }
 0x374   :  { %v1168_v32 = vpop.eup %1167 }
 0x375   :  { %v654_v33 = vmul.f32 %v1168_v32, %v653_v31 }
 0x377   :  { %v1582_v36 = vadd.f32 %v655_v35, %v654_v33 }
 0x379   :  { %v658_v37 = vrot.slane %v1582_v36, 1  ;;  %660 = vst.msk [vmem:[%s1681_s6 + $0x4] sm:$0x1] %vm179_vm10, %v1582_v36  ;;  %1091 = vmatmul.msk.f32.vlgmr.msrb.gmra.mxu3 %vm56_vm1, %v1582_v36  ;;  %1092 = vmatmul.msk.f32.vlgmr.msra.gmra.mxu0 %vm56_vm1, %v1582_v36 }
 0x37a   :  { %1093 = vmatmul.msk.f32.vlgmr.msra.gmra.mxu1 %vm56_vm1, %v1582_v36  ;;  %956 = vmatpush.msrb.mxu3 %v1313_v8 }
 0x37b   :  { %661 = vst.msk [vmem:[%s1681_s6 + $0xc] sm:$0x1] %vm179_vm10, %v658_v37 }
 0x37c   :  { %957 = vmatpush.msrb.mxu3 %v1318_v9 }
 0x37e   :  { %958 = vmatpush.msrb.mxu3 %v1329_v11 }
 0x380   :  { %959 = vmatpush.msrb.mxu3 %v1341_v12 }
 0x3f6   :  { %v701_v38 = vpop.f32.mrf.mxu0 }
 0x3f7   :  { %v702_v40 = vadd.f32 %v1390_v15, %v701_v38  ;;  %v721_v52 = vpop.f32.mrf.mxu1 }
 0x3f8   :  { %v722_v53 = vadd.f32 %v1403_v34, %v721_v52 }
 0x3f9   :  { %v748_v41 = vadd.f32 %v1096_v39, %v702_v40 }
 0x3fb   :  { %v1097_v8 = vmul.f32 -1.442695, %v748_v41 }
 0x3fc   :  { %v681_v42 = vpop.f32.mrf.mxu3 }
 0x3fd   :  { %1169 = vpow2.f32 %v1097_v8  ;;  %v682_v9 = vadd.f32 %v1385_v14, %v681_v42 }
 0x3ff   :  { %v726_v11 = vadd.f32 %v1094_v43, %v682_v9 }
 0x401   :  { %v1095_v44 = vmul.f32 -1.442695, %v726_v11 }
 0x403   :  { %v1170_v12 = vpop.eup %1169  ;;  %1171 = vpow2.f32 %v1095_v44 }
 0x404   :  { %v752_v45 = vadd.f32 1.0, %v1170_v12 }
 0x406   :  { %1173 = vrcp.f32 %v752_v45  ;;  %v764_v58 = vand.u32 2147483648, %v752_v45  ;;  %vm758_vm8 = vweird.f32 %v752_v45  ;;  %v762_v60 = vand.u32 2147483647, %v752_v45 }
 0x408   :  { %v765_v63 = vor.u32 1.1754944e-38, %v764_v58  ;;  %vm763_vm11 = vcmp.eq.f32.partialorder %v762_v60, 8.507059e+37 }
 0x409   :  { %v1172_v46 = vpop.eup %1171 }
 0x40a   :  { %v730_v47 = vadd.f32 1.0, %v1172_v46 }
 0x40c   :  { %1175 = vrcp.f32 %v730_v47  ;;  %v1174_v48 = vpop.eup %1173  ;;  %v742_v4 = vand.u32 2147483648, %v730_v47  ;;  %v740_v50 = vand.u32 2147483647, %v730_v47  ;;  %vm736_vm4 = vweird.f32 %v730_v47 }
 0x40d   :  { %v754_v49 = vmul.f32 %v1174_v48, %v752_v45  ;;  %vm759_vm7 = vweird.f32 %v1174_v48 }
 0x40e   :  { %v743_v10 = vor.u32 1.1754944e-38, %v742_v4  ;;  %vm741_vm6 = vcmp.eq.f32.partialorder %v740_v50, 8.507059e+37  ;;  %vm760_vm9 = vmor %vm758_vm8, %vm759_vm7 }
 0x40f   :  { %v755_v2 = vsub.f32 1.0, %v754_v49 }
 0x411   :  { %v756_v51 = vmul.f32 %v1174_v48, %v755_v2 }
 0x412   :  { %v1176_v0 = vpop.eup %1175 }
 0x413   :  { %v732_v1 = vmul.f32 %v1176_v0, %v730_v47  ;;  %vm737_vm3 = vweird.f32 %v1176_v0  ;;  %v757_v55 = vadd.f32 %v1174_v48, %v756_v51 }
 0x414   :  { %vm738_vm5 = vmor %vm736_vm4, %vm737_vm3 }
 0x415   :  { %v733_v3 = vsub.f32 1.0, %v732_v1  ;;  %v761_v62 = vsel %vm760_vm9, %v1174_v48, %v757_v55  ;;  %v1106_v48 = vld [vmem:[%s1677_s2 + $0xc] sm:$0x3] }
 0x416   :  { %v766_v6 = vsel %vm763_vm11, %v765_v63, %v761_v62 }
 0x417   :  { %v734_v5 = vmul.f32 %v1176_v0, %v733_v3  ;;  %v773_v13 = vsub.f32 1.0, %v766_v6  ;;  %v775_v18 = vmul.f32 %v766_v6, %v1582_v36 }
 0x419   :  { %v735_v7 = vadd.f32 %v1176_v0, %v734_v5 }
 0x41b   :  { %v739_v54 = vsel %vm738_vm5, %v1176_v0, %v735_v7 }
 0x41c   :  { %v744_v56 = vsel %vm741_vm6, %v743_v10, %v739_v54 }
 0x41d   :  { %v770_v59 = vmul.f32 %v744_v56, %v722_v53  ;;  %v1110_v56 = vld [vmem:[%s1675_s0 + $0xe] sm:$0x3] }
 0x41f   :  { %v771_v61 = vadd.f32 %v1098_v57, %v770_v59 }
 0x421   :  { %1177 = vtanh.f32 %v771_v61  ;;  %v1112_v61 = vld [vmem:[%s1676_s1 + $0xe] sm:$0x3] }
 0x427   :  { %v1178_v16 = vpop.eup %1177 }
 0x428   :  { %v774_v17 = vmul.f32 %v1178_v16, %v773_v13 }
 0x42a   :  { %v776_v19 = vadd.f32 %v775_v18, %v774_v17 }
 0x42c   :  { %v778_v20 = vrot.slane %v776_v19, 1  ;;  %780 = vst.msk [vmem:[%s1681_s6 + $0x5] sm:$0x1] %vm179_vm10, %v776_v19  ;;  %1099 = vmatmul.msk.f32.vlgmr.msra.gmra.mxu2 %vm56_vm1, %v776_v19  ;;  %1100 = vmatmul.msk.f32.vlgmr.msra.gmra.mxu3 %vm56_vm1, %v776_v19 }
 0x42d   :  { %1101 = vmatmul.msk.f32.vlgmr.msrb.gmra.mxu0 %vm56_vm1, %v776_v19 }
 0x42e   :  { %781 = vst.msk [vmem:[%s1681_s6 + $0xd] sm:$0x1] %vm179_vm10, %v778_v20 }
 0x4aa   :  { %v841_v9 = vpop.f32.mrf.mxu0 }
 0x4ab   :  { %v842_v45 = vadd.f32 %v1403_v34, %v841_v9 }
 0x4af   :  { %v801_v21 = vpop.f32.mrf.mxu2  ;;  %v821_v23 = vpop.f32.mrf.mxu3 }
 0x4b0   :  { %v802_v25 = vadd.f32 %v1385_v14, %v801_v21  ;;  %v822_v26 = vadd.f32 %v1390_v15, %v821_v23 }
 0x4b2   :  { %v846_v27 = vadd.f32 %v1102_v22, %v802_v25  ;;  %v868_v28 = vadd.f32 %v1104_v24, %v822_v26 }
 0x4b4   :  { %v1103_v29 = vmul.f32 -1.442695, %v846_v27  ;;  %v1105_v30 = vmul.f32 -1.442695, %v868_v28 }
 0x4b6   :  { %1179 = vpow2.f32 %v1103_v29 }
 0x4b7   :  { %1181 = vpow2.f32 %v1105_v30 }
 0x4bc   :  { %v1180_v31 = vpop.eup %1179 }
 0x4bd   :  { %v1182_v32 = vpop.eup %1181  ;;  %v850_v33 = vadd.f32 1.0, %v1180_v31 }
 0x4be   :  { %v872_v35 = vadd.f32 1.0, %v1182_v32  ;;  %v1114_v32 = vld [vmem:[%s1677_s2 + $0xe] sm:$0x3]  ;;  %s1031_s2 = sshll.u32 %s1225_s27, 4  ;;  %s1032_s2 = int_to_ptr.vmem [resolvable:$true] %s1031_s2 }
 0x4bf   :  { %1183 = vrcp.f32 %v850_v33  ;;  %v862_v41 = vand.u32 2147483648, %v850_v33  ;;  %v860_v43 = vand.u32 2147483647, %v850_v33  ;;  %vm856_vm13 = vweird.f32 %v850_v33 }
 0x4c0   :  { %1185 = vrcp.f32 %v872_v35  ;;  %v884_v1 = vand.u32 2147483648, %v872_v35  ;;  %vm878_vm3 = vweird.f32 %v872_v35  ;;  %v882_v2 = vand.u32 2147483647, %v872_v35 }
 0x4c1   :  { %v863_v12 = vor.u32 1.1754944e-38, %v862_v41  ;;  %vm861_vm15 = vcmp.eq.f32.partialorder %v860_v43, 8.507059e+37 }
 0x4c2   :  { %v885_v5 = vor.u32 1.1754944e-38, %v884_v1  ;;  %vm883_vm5 = vcmp.eq.f32.partialorder %v882_v2, 8.507059e+37 }
 0x4c5   :  { %v1184_v36 = vpop.eup %1183 }
 0x4c6   :  { %v1186_v37 = vpop.eup %1185  ;;  %v852_v38 = vmul.f32 %v1184_v36, %v850_v33  ;;  %vm857_vm12 = vweird.f32 %v1184_v36 }
 0x4c7   :  { %v874_v39 = vmul.f32 %v1186_v37, %v872_v35  ;;  %vm858_vm14 = vmor %vm856_vm13, %vm857_vm12  ;;  %vm879_vm2 = vweird.f32 %v1186_v37 }
 0x4c8   :  { %v853_v40 = vsub.f32 1.0, %v852_v38  ;;  %vm880_vm4 = vmor %vm878_vm3, %vm879_vm2 }
 0x4c9   :  { %v875_v8 = vsub.f32 1.0, %v874_v39 }
 0x4ca   :  { %v854_v42 = vmul.f32 %v1184_v36, %v853_v40 }
 0x4cb   :  { %v876_v11 = vmul.f32 %v1186_v37, %v875_v8 }
 0x4cc   :  { %v855_v44 = vadd.f32 %v1184_v36, %v854_v42 }
 0x4cd   :  { %v877_v49 = vadd.f32 %v1186_v37, %v876_v11 }
 0x4ce   :  { %v859_v46 = vsel %vm858_vm14, %v1184_v36, %v855_v44 }
 0x4cf   :  { %v864_v47 = vsel %vm861_vm15, %v863_v12, %v859_v46  ;;  %v881_v4 = vsel %vm880_vm4, %v1186_v37, %v877_v49 }
 0x4d0   :  { %v890_v0 = vmul.f32 %v864_v47, %v842_v45  ;;  %v886_v50 = vsel %vm883_vm5, %v885_v5, %v881_v4 }
 0x4d1   :  { %v893_v51 = vsub.f32 1.0, %v886_v50  ;;  %v895_v10 = vmul.f32 %v886_v50, %v776_v19 }
 0x4d2   :  { %v891_v3 = vadd.f32 %v1106_v48, %v890_v0 }
 0x4d4   :  { %1187 = vtanh.f32 %v891_v3 }
 0x4da   :  { %v1188_v52 = vpop.eup %1187 }
 0x4db   :  { %v894_v7 = vmul.f32 %v1188_v52, %v893_v51 }
 0x4dd   :  { %v896_v53 = vadd.f32 %v895_v10, %v894_v7 }
 0x4df   :  { %v898_v54 = vrot.slane %v896_v53, 1  ;;  %900 = vst.msk [vmem:[%s1681_s6 + $0x6] sm:$0x1] %vm179_vm10, %v896_v53  ;;  %1107 = vmatmul.msk.f32.vlgmr.msrb.gmra.mxu1 %vm56_vm1, %v896_v53  ;;  %1108 = vmatmul.msk.f32.vlgmr.msrb.gmra.mxu2 %vm56_vm1, %v896_v53 }
 0x4e0   :  { %1109 = vmatmul.msk.f32.vlgmr.msrb.gmra.mxu3 %vm56_vm1, %v896_v53 }
 0x4e1   :  { %901 = vst.msk [vmem:[%s1681_s6 + $0xe] sm:$0x1] %vm179_vm10, %v898_v54 }
 0x55c   :  { %v921_v55 = vpop.f32.mrf.mxu1 }
 0x55d   :  { %v922_v57 = vadd.f32 %v1385_v14, %v921_v55 }
 0x55f   :  { %v966_v58 = vadd.f32 %v1110_v56, %v922_v57 }
 0x561   :  { %v1111_v59 = vmul.f32 -1.442695, %v966_v58 }
 0x562   :  { %v941_v60 = vpop.f32.mrf.mxu2 }
 0x563   :  { %1189 = vpow2.f32 %v1111_v59  ;;  %v942_v62 = vadd.f32 %v1390_v15, %v941_v60  ;;  %v961_v25 = vpop.f32.mrf.mxu3 }
 0x564   :  { %v962_v29 = vadd.f32 %v1403_v34, %v961_v25 }
 0x565   :  { %v988_v63 = vadd.f32 %v1112_v61, %v942_v62 }
 0x567   :  { %v1113_v6 = vmul.f32 -1.442695, %v988_v63 }
 0x569   :  { %v1190_v13 = vpop.eup %1189  ;;  %1191 = vpow2.f32 %v1113_v6 }
 0x56a   :  { %v970_v16 = vadd.f32 1.0, %v1190_v13 }
 0x56c   :  { %1193 = vrcp.f32 %v970_v16  ;;  %v982_v21 = vand.u32 2147483648, %v970_v16  ;;  %v980_v23 = vand.u32 2147483647, %v970_v16  ;;  %vm976_vm6 = vweird.f32 %v970_v16 }
 0x56e   :  { %v983_v27 = vor.u32 1.1754944e-38, %v982_v21  ;;  %vm981_vm8 = vcmp.eq.f32.partialorder %v980_v23, 8.507059e+37 }
 0x56f   :  { %v1192_v17 = vpop.eup %1191 }
 0x570   :  { %v992_v18 = vadd.f32 1.0, %v1192_v17 }
 0x572   :  { %v1194_v19 = vpop.eup %1193  ;;  %1195 = vrcp.f32 %v992_v18  ;;  %v1004_v35 = vand.u32 2147483648, %v992_v18  ;;  %v1002_v37 = vand.u32 2147483647, %v992_v18  ;;  %vm998_vm11 = vweird.f32 %v992_v18 }
 0x573   :  { %v972_v14 = vmul.f32 %v1194_v19, %v970_v16  ;;  %vm977_vm1 = vweird.f32 %v1194_v19 }
 0x574   :  { %vm978_vm7 = vmor %vm976_vm6, %vm977_vm1  ;;  %v1005_v40 = vor.u32 1.1754944e-38, %v1004_v35  ;;  %vm1003_vm13 = vcmp.eq.f32.partialorder %v1002_v37, 8.507059e+37 }
 0x575   :  { %v973_v20 = vsub.f32 1.0, %v972_v14 }
 0x577   :  { %v974_v22 = vmul.f32 %v1194_v19, %v973_v20 }
 0x578   :  { %v1196_v24 = vpop.eup %1195 }
 0x579   :  { %v994_v26 = vmul.f32 %v1196_v24, %v992_v18  ;;  %v975_v15 = vadd.f32 %v1194_v19, %v974_v22  ;;  %vm999_vm9 = vweird.f32 %v1196_v24 }
 0x57a   :  { %vm1000_vm12 = vmor %vm998_vm11, %vm999_vm9 }
 0x57b   :  { %v995_v28 = vsub.f32 1.0, %v994_v26  ;;  %v979_v30 = vsel %vm978_vm7, %v1194_v19, %v975_v15 }
 0x57c   :  { %v984_v31 = vsel %vm981_vm8, %v983_v27, %v979_v30 }
 0x57d   :  { %v996_v33 = vmul.f32 %v1196_v24, %v995_v28  ;;  %v1010_v36 = vmul.f32 %v984_v31, %v962_v29 }
 0x57f   :  { %v997_v38 = vadd.f32 %v1196_v24, %v996_v33  ;;  %v1011_v39 = vadd.f32 %v1114_v32, %v1010_v36 }
 0x581   :  { %v1001_v41 = vsel %vm1000_vm12, %v1196_v24, %v997_v38  ;;  %1197 = vtanh.f32 %v1011_v39 }
 0x582   :  { %v1006_v34 = vsel %vm1003_vm13, %v1005_v40, %v1001_v41 }
 0x583   :  { %v1013_v8 = vsub.f32 1.0, %v1006_v34  ;;  %v1015_v9 = vmul.f32 %v1006_v34, %v896_v53 }
 0x587   :  { %v1198_v42 = vpop.eup %1197 }
 0x588   :  { %v1014_v43 = vmul.f32 %v1198_v42, %v1013_v8 }
 0x58a   :  { %v1016_v11 = vadd.f32 %v1015_v9, %v1014_v43 }
 0x58c   :  { %v1018_v44 = vrot.slane %v1016_v11, 1  ;;  %1020 = vst.msk [vmem:[%s1681_s6 + $0x7] sm:$0x1] %vm179_vm10, %v1016_v11 }
 0x58d   :  { %1023 = vst.msk [vmem:[#allocation2] sm:$0x3] %vm31_vm0, %v1016_v11 }
 0x58e   :  { %1021 = vst.msk [vmem:[%s1681_s6 + $0xf] sm:$0x1] %vm179_vm10, %v1018_v44  ;;  %1036 = dma.vmem_to_hbm [thread:$0]  %s1032_s2, 32, %s1034_s30, [#allocation3]  }
 0x58f   :  { %1223 = dma.done.wait [#allocation3], 32  }
 0x590   :  { %1224 = vsyncadd [#allocation3], 4294967264 }
 0x591   :  { %1043 = vsyncpa [#allocation3], 1 }

</bundles_post_ra>
